<compile_context>
chip_gen: v7x
topology: tpu7x:2x2x1
jax: 0.10.0
libtpu: 0.0.40
codegen_flags: <defaults>
</compile_context>

<pallas_src>
import functools

import jax
import jax.numpy as jnp
import numpy as np
from jax.experimental import pallas as pl
from jax.experimental.pallas import tpu as pltpu

LANE = 128        # all class dims padded to the 128-lane vreg width (lane-dense loads/stores)
NEG_INF = -1e9    # pad value for logits: padded classes never win softmax / argmax

# Lane layout of the (1, 128) accumulator produced by the kernel (raw sums).
(_OBJ_CE_NUM, _OBJ_CE_DEN, _CARD_ERR, _MATCH_NLL,
 _VERB_POS, _VERB_NEG, _VERB_NPOS, _VERB_SOFT,
 _L1_SUB, _L1_OBJ, _EXIST_OBJ, _GIOU_SUB, _GIOU_OBJ,
 _OBJ_CORRECT, _N_MATCHED, _MATCH_CORRECT) = range(16)


# ----------------------------------------------------------------------------------
# Shared math helpers (pure jnp; used inside the kernel and by the JAX reference).
# ----------------------------------------------------------------------------------
def _box_cxcywh_to_xyxy(b):
    cx, cy, w, h = b[:, 0:1], b[:, 1:2], b[:, 2:3], b[:, 3:4]
    return cx - 0.5 * w, cy - 0.5 * h, cx + 0.5 * w, cy + 0.5 * h


def _giou_diag(a, b):
    """Pairwise (diagonal) generalized IoU of cxcywh boxes. (N, 4) x (N, 4) -> (N, 1)."""
    ax0, ay0, ax1, ay1 = _box_cxcywh_to_xyxy(a)
    bx0, by0, bx1, by1 = _box_cxcywh_to_xyxy(b)
    area_a = (ax1 - ax0) * (ay1 - ay0)
    area_b = (bx1 - bx0) * (by1 - by0)
    iw = jnp.maximum(jnp.minimum(ax1, bx1) - jnp.maximum(ax0, bx0), 0.0)
    ih = jnp.maximum(jnp.minimum(ay1, by1) - jnp.maximum(ay0, by0), 0.0)
    inter = iw * ih
    union = area_a + area_b - inter
    iou = inter / union
    ew = jnp.maximum(ax1, bx1) - jnp.minimum(ax0, bx0)
    eh = jnp.maximum(ay1, by1) - jnp.minimum(ay0, by0)
    earea = ew * eh
    return iou - (earea - union) / earea


def _pad_lane(x, value):
    """Pad the last (class) dim up to the 128-lane width."""
    pad = LANE - x.shape[-1]
    return jnp.pad(x, [(0, 0)] * (x.ndim - 1) + [(0, pad)], constant_values=value)


# ----------------------------------------------------------------------------------
# The fused Pallas kernel: one grid step per batch image, all losses in one pass.
# ----------------------------------------------------------------------------------
def _criterion_kernel(obj_logits_ref, obj_onehot_ref, obj_w_ref,
                      verb_logits_ref, verb_tgt_ref,
                      match_logits_ref, match_onehot_ref,
                      psub_ref, pobj_ref, tsub_ref, tobj_ref, matched_ref,
                      acc_ref, *, num_obj_classes, num_verb_classes, alpha):
    b = pl.program_id(0)

    @pl.when(b == 0)
    def _init():
        acc_ref[...] = jnp.zeros_like(acc_ref)

    f32 = jnp.float32
    matched = matched_ref[...]                       # (Q, 1), 1.0 where the query is matched

    # ---- loss_obj_labels: class-weighted softmax cross-entropy -------------------
    ql = obj_logits_ref[...]                         # (Q, 128), padded with NEG_INF
    qoh = obj_onehot_ref[...]                        # (Q, 128) one-hot of target class
    qw = obj_w_ref[...]                              # (Q, 1)   empty_weight[target class]
    qmax = jnp.max(ql, axis=-1, keepdims=True)
    lse = qmax + jnp.log(jnp.sum(jnp.exp(ql - qmax), axis=-1, keepdims=True))
    tgt_logit = jnp.sum(qoh * ql, axis=-1, keepdims=True)
    nll = lse - tgt_logit                            # (Q, 1)
    obj_ce_num = jnp.sum(qw * nll)
    obj_ce_den = jnp.sum(qw)
    obj_correct = jnp.sum(matched * (tgt_logit >= qmax).astype(f32))
    n_matched = jnp.sum(matched)

    # ---- loss_obj_cardinality ------------------------------------------------------
    lane = jax.lax.broadcasted_iota(jnp.int32, ql.shape, 1)
    max_fg = jnp.max(jnp.where(lane < num_obj_classes, ql, NEG_INF), axis=-1, keepdims=True)
    noobj = jnp.sum(jnp.where(lane == num_obj_classes, ql, 0.0), axis=-1, keepdims=True)
    # (max over foreground classes >= no-object logit) == (argmax != no-object)
    card_pred = jnp.sum((max_fg >= noobj).astype(f32))
    card_err = jnp.abs(card_pred - n_matched)

    # ---- loss_matching_labels ------------------------------------------------------
    ml = match_logits_ref[...]
    moh = match_onehot_ref[...]
    mmax = jnp.max(ml, axis=-1, keepdims=True)
    mlse = mmax + jnp.log(jnp.sum(jnp.exp(ml - mmax), axis=-1, keepdims=True))
    m_tgt = jnp.sum(moh * ml, axis=-1, keepdims=True)
    match_nll = jnp.sum(mlse - m_tgt)
    match_correct = jnp.sum(matched * (m_tgt >= mmax).astype(f32))

    # ---- loss_verb_labels: focal BCE ('focal_bce') ---------------------------------
    vl = verb_logits_ref[...]
    vt = verb_tgt_ref[...]
    vvalid = jax.lax.broadcasted_iota(jnp.int32, vl.shape, 1) < num_verb_classes
    pred = jax.nn.sigmoid(vl)
    pos = jnp.logical_and(vvalid, vt == 1.0)
    neg = jnp.logical_and(vvalid, vt == 0.0)
    soft = jnp.logical_and(vvalid, jnp.logical_and(vt > 0.0, vt < 1.0))
    log_p = jnp.log(pred)
    log_1p = jnp.log(1.0 - pred)
    pos_loss = jnp.where(pos, alpha * log_p * jnp.square(1.0 - pred), 0.0)
    neg_loss = jnp.where(neg, (1.0 - alpha) * log_1p * jnp.square(pred), 0.0)
    soft_loss = jnp.where(soft, -(vt * log_p + (1.0 - vt) * log_1p), 0.0)
    verb_pos = jnp.sum(pos_loss)
    verb_neg = jnp.sum(neg_loss)
    verb_npos = jnp.sum(pos.astype(f32))
    verb_soft = jnp.sum(soft_loss)

    # ---- loss_sub_obj_boxes: L1 + GIoU on matched pairs ----------------------------
    ps = psub_ref[...]
    po = pobj_ref[...]
    ts = tsub_ref[...]
    to = tobj_ref[...]
    exist_obj = matched * jnp.max((to != 0.0).astype(f32), axis=-1, keepdims=True)
    l1_sub = jnp.sum(matched * jnp.abs(ps - ts))
    l1_obj = jnp.sum(exist_obj * jnp.abs(po - to))
    giou_sub = jnp.sum(matched * (1.0 - _giou_diag(ps, ts)))
    giou_obj = jnp.sum(exist_obj * (1.0 - _giou_diag(po, to)))
    exist_cnt = jnp.sum(exist_obj)

    # ---- accumulate the raw sums into the lane-dense (1, 128) output ---------------
    vals = [obj_ce_num, obj_ce_den, card_err, match_nll,
            verb_pos, verb_neg, verb_npos, verb_soft,
            l1_sub, l1_obj, exist_cnt, giou_sub, giou_obj,
            obj_correct, n_matched, match_correct]
    out_lane = jax.lax.broadcasted_iota(jnp.int32, (1, LANE), 1)
    partial_vec = jnp.zeros((1, LANE), f32)
    for k, v in enumerate(vals):
        partial_vec = partial_vec + jnp.where(out_lane == k, v, 0.0)
    acc_ref[...] += partial_vec


# ----------------------------------------------------------------------------------
# Host-side scatter of per-image targets (mirrors the PyTorch advanced indexing).
# ----------------------------------------------------------------------------------
def _scatter_targets(targets, indices, B, Q, num_obj_classes, num_verb_classes):
    tgt_cls = jnp.full((B, Q), num_obj_classes, jnp.int32)       # default: "no-object"
    verb_tgt = jnp.zeros((B, Q, num_verb_classes), jnp.float32)
    match_tgt = jnp.zeros((B, Q), jnp.int32)
    tgt_sub = jnp.zeros((B, Q, 4), jnp.float32)
    tgt_obj = jnp.zeros((B, Q, 4), jnp.float32)
    matched = jnp.zeros((B, Q), jnp.float32)
    for b, (src, tgt) in enumerate(indices):
        src = np.asarray(src, np.int32)
        tgt = np.asarray(tgt, np.int32)
        if src.size == 0:
            continue
        t = targets[b]
        tgt_cls = tgt_cls.at[b, src].set(t['obj_labels'][tgt])
        verb_tgt = verb_tgt.at[b, src].set(t['verb_labels'][tgt])
        match_tgt = match_tgt.at[b, src].set(1)
        tgt_sub = tgt_sub.at[b, src].set(t['sub_boxes'][tgt])
        tgt_obj = tgt_obj.at[b, src].set(t['obj_boxes'][tgt])
        matched = matched.at[b, src].set(1.0)
    return tgt_cls, verb_tgt, match_tgt, tgt_sub, tgt_obj, matched


# ----------------------------------------------------------------------------------
# Fused forward: padding + one pallas_call + a tiny scalar epilogue, all under one jit.
# ----------------------------------------------------------------------------------
@functools.partial(jax.jit, static_argnames=("num_obj_classes", "num_verb_classes",
                                             "eos_coef", "alpha"))
def _fused_losses(obj_logits, verb_logits, match_logits, pred_sub, pred_obj,
                  tgt_cls, verb_tgt, match_tgt, tgt_sub, tgt_obj, matched,
                  *, num_obj_classes, num_verb_classes, eos_coef, alpha):
    B, Q, _ = obj_logits.shape
    assert Q % 8 == 0, "num_queries must be a multiple of 8 (sublane tiling)"
    # TODO(synk): for Q like 100, pad queries to a multiple of 8 and thread a query-valid mask.

    empty_weight = jnp.ones((num_obj_classes + 1,), jnp.float32).at[-1].set(eos_coef)

    obj_logits_p = _pad_lane(obj_logits, NEG_INF)
    verb_logits_p = _pad_lane(verb_logits, 0.0)
    verb_tgt_p = _pad_lane(verb_tgt, 0.0)
    match_logits_p = _pad_lane(match_logits, NEG_INF)
    obj_onehot = jax.nn.one_hot(tgt_cls, LANE, dtype=jnp.float32)
    match_onehot = jax.nn.one_hot(match_tgt, LANE, dtype=jnp.float32)
    obj_w = empty_weight[tgt_cls][..., None]
    matched3 = matched[..., None]

    kernel = functools.partial(_criterion_kernel,
                               num_obj_classes=num_obj_classes,
                               num_verb_classes=num_verb_classes,
                               alpha=alpha)
    lane_spec = pl.BlockSpec((None, Q, LANE), lambda b: (b, 0, 0))
    box_spec = pl.BlockSpec((None, Q, 4), lambda b: (b, 0, 0))
    vec_spec = pl.BlockSpec((None, Q, 1), lambda b: (b, 0, 0))

    sums = pl.pallas_call(
        kernel,
        out_shape=jax.ShapeDtypeStruct((1, LANE), jnp.float32),
        grid=(B,),
        in_specs=[lane_spec, lane_spec, vec_spec,
                  lane_spec, lane_spec,
                  lane_spec, lane_spec,
                  box_spec, box_spec, box_spec, box_spec, vec_spec],
        out_specs=pl.BlockSpec((1, LANE), lambda b: (0, 0)),
        compiler_params=pltpu.CompilerParams(
            # batch axis reduces into a single VMEM-resident output block -> "arbitrary"
            dimension_semantics=("arbitrary",),
        ),
    )(obj_logits_p, obj_onehot, obj_w,
      verb_logits_p, verb_tgt_p,
      match_logits_p, match_onehot,
      pred_sub, pred_obj, tgt_sub, tgt_obj, matched3)[0]

    # ---- tiny scalar epilogue (normalisations / conditionals) ----------------------
    n_matched = sums[_N_MATCHED]
    num_interactions = jnp.maximum(n_matched, 1.0)     # world_size == 1, clamp(min=1)
    denom_matched = jnp.maximum(n_matched, 1.0)
    num_pos = sums[_VERB_NPOS]
    exist_den = sums[_EXIST_OBJ] + 1e-4
    return {
        'loss_obj_ce': sums[_OBJ_CE_NUM] / sums[_OBJ_CE_DEN],
        'obj_class_error': 100.0 - 100.0 * sums[_OBJ_CORRECT] / denom_matched,
        'obj_cardinality_error': sums[_CARD_ERR] / B,
        'loss_verb_ce': jnp.where(num_pos > 0,
                                  -(sums[_VERB_POS] + sums[_VERB_NEG]) / jnp.maximum(num_pos, 1.0),
                                  -sums[_VERB_NEG]),
        'loss_verb_clip': sums[_VERB_SOFT] / (B * Q * num_verb_classes),
        'loss_matching': sums[_MATCH_NLL] / (B * Q),
        'matching_error': 100.0 - 100.0 * sums[_MATCH_CORRECT] / denom_matched,
        'loss_sub_bbox': sums[_L1_SUB] / num_interactions,
        'loss_obj_bbox': sums[_L1_OBJ] / exist_den,
        'loss_sub_giou': sums[_GIOU_SUB] / num_interactions,
        'loss_obj_giou': sums[_GIOU_OBJ] / exist_den,
    }


def set_criterion_hoi(outputs, targets, indices, *, num_obj_classes, num_verb_classes,
                      eos_coef=0.1, alpha=0.5):
    B, Q, _ = outputs['pred_obj_logits'].shape
    dense = _scatter_targets(targets, indices, B, Q, num_obj_classes, num_verb_classes)
    return _fused_losses(outputs['pred_obj_logits'], outputs['pred_verb_logits'],
                         outputs['pred_matching_logits'],
                         outputs['pred_sub_boxes'], outputs['pred_obj_boxes'],
                         *dense,
                         num_obj_classes=num_obj_classes, num_verb_classes=num_verb_classes,
                         eos_coef=eos_coef, alpha=alpha)


# ----------------------------------------------------------------------------------
# Pure-JAX reference (same math, unpadded) for correctness checking.
# ----------------------------------------------------------------------------------
def set_criterion_hoi_ref(outputs, targets, indices, *, num_obj_classes, num_verb_classes,
                          eos_coef=0.1, alpha=0.5):
    obj_logits = outputs['pred_obj_logits']
    verb_logits = outputs['pred_verb_logits']
    match_logits = outputs['pred_matching_logits']
    pred_sub = outputs['pred_sub_boxes']
    pred_obj = outputs['pred_obj_boxes']
    B, Q, _ = obj_logits.shape
    tgt_cls, verb_tgt, match_tgt, tgt_sub, tgt_obj, matched = _scatter_targets(
        targets, indices, B, Q, num_obj_classes, num_verb_classes)
    empty_weight = jnp.ones((num_obj_classes + 1,), jnp.float32).at[-1].set(eos_coef)

    def logsumexp(x):
        m = jnp.max(x, axis=-1)
        return m + jnp.log(jnp.sum(jnp.exp(x - m[..., None]), axis=-1))

    lse = logsumexp(obj_logits)
    tgt_logit = jnp.take_along_axis(obj_logits, tgt_cls[..., None], axis=-1)[..., 0]
    nll = lse - tgt_logit
    w = empty_weight[tgt_cls]
    n_matched = jnp.sum(matched)
    denom_matched = jnp.maximum(n_matched, 1.0)
    obj_correct = jnp.sum(matched * (tgt_logit >= jnp.max(obj_logits, axis=-1)).astype(jnp.float32))

    card_pred = jnp.sum((jnp.max(obj_logits[..., :num_obj_classes], axis=-1)
                         >= obj_logits[..., num_obj_classes]).astype(jnp.float32), axis=1)
    tgt_len = jnp.sum(matched, axis=1)

    mlse = logsumexp(match_logits)
    m_tgt_logit = jnp.take_along_axis(match_logits, match_tgt[..., None], axis=-1)[..., 0]
    match_correct = jnp.sum(matched * (m_tgt_logit >= jnp.max(match_logits, axis=-1)).astype(jnp.float32))

    pred = jax.nn.sigmoid(verb_logits)
    pos = verb_tgt == 1.0
    neg = verb_tgt == 0.0
    soft = jnp.logical_and(verb_tgt > 0.0, verb_tgt < 1.0)
    log_p = jnp.log(pred)
    log_1p = jnp.log(1.0 - pred)
    pos_loss = jnp.sum(jnp.where(pos, alpha * log_p * jnp.square(1.0 - pred), 0.0))
    neg_loss = jnp.sum(jnp.where(neg, (1.0 - alpha) * log_1p * jnp.square(pred), 0.0))
    soft_loss = jnp.mean(jnp.where(soft, -(verb_tgt * log_p + (1.0 - verb_tgt) * log_1p), 0.0))
    num_pos = jnp.sum(pos.astype(jnp.float32))

    exist_obj = matched * jnp.max((tgt_obj != 0.0).astype(jnp.float32), axis=-1)
    num_interactions = jnp.maximum(n_matched, 1.0)
    giou_s = _giou_diag(pred_sub.reshape(-1, 4), tgt_sub.reshape(-1, 4)).reshape(B, Q)
    giou_o = _giou_diag(pred_obj.reshape(-1, 4), tgt_obj.reshape(-1, 4)).reshape(B, Q)

    return {
        'loss_obj_ce': jnp.sum(w * nll) / jnp.sum(w),
        'obj_class_error': 100.0 - 100.0 * obj_correct / denom_matched,
        'obj_cardinality_error': jnp.mean(jnp.abs(card_pred - tgt_len)),
        'loss_verb_ce': jnp.where(num_pos > 0,
                                  -(pos_loss + neg_loss) / jnp.maximum(num_pos, 1.0),
                                  -neg_loss),
        'loss_verb_clip': soft_loss,
        'loss_matching': jnp.mean(mlse - m_tgt_logit),
        'matching_error': 100.0 - 100.0 * match_correct / denom_matched,
        'loss_sub_bbox': jnp.sum(matched[..., None] * jnp.abs(pred_sub - tgt_sub)) / num_interactions,
        'loss_obj_bbox': jnp.sum(exist_obj[..., None] * jnp.abs(pred_obj - tgt_obj)) / (jnp.sum(exist_obj) + 1e-4),
        'loss_sub_giou': jnp.sum(matched * (1.0 - giou_s)) / num_interactions,
        'loss_obj_giou': jnp.sum(exist_obj * (1.0 - giou_o)) / (jnp.sum(exist_obj) + 1e-4),
    }


if __name__ == "__main__":
    key = jax.random.PRNGKey(0)
    B, Q = 2, 8                       # batch, num_queries
    num_obj_classes, num_verb_classes = 4, 8
    keys = jax.random.split(key, 10)

    outputs = {
        'pred_obj_logits': jax.random.normal(keys[0], (B, Q, num_obj_classes + 1), jnp.float32),
        'pred_verb_logits': jax.random.normal(keys[1], (B, Q, num_verb_classes), jnp.float32),
        'pred_matching_logits': jax.random.normal(keys[2], (B, Q, 2), jnp.float32),
        'pred_sub_boxes': jax.nn.sigmoid(jax.random.normal(keys[3], (B, Q, 4), jnp.float32)),
        'pred_obj_boxes': jax.nn.sigmoid(jax.random.normal(keys[4], (B, Q, 4), jnp.float32)),
    }
    targets = [
        {
            'obj_labels': jnp.array([0, 2, 3], jnp.int32),
            'verb_labels': (jax.random.uniform(keys[5], (3, num_verb_classes)) > 0.6).astype(jnp.float32),
            'sub_boxes': jax.nn.sigmoid(jax.random.normal(keys[6], (3, 4), jnp.float32)),
            'obj_boxes': jax.nn.sigmoid(jax.random.normal(keys[7], (3, 4), jnp.float32)).at[2].set(0.0),
        },
        {
            'obj_labels': jnp.array([1, 3], jnp.int32),
            'verb_labels': (jax.random.uniform(keys[8], (2, num_verb_classes)) > 0.5).astype(jnp.float32),
            'sub_boxes': jax.nn.sigmoid(jax.random.normal(keys[9], (2, 4), jnp.float32)),
            'obj_boxes': jax.nn.sigmoid(jax.random.normal(keys[9], (2, 4), jnp.float32) + 0.3),
        },
    ]
    # Hungarian-matcher output (the matcher is an external module; its indices are inputs).
    indices = [(np.array([1, 4, 6]), np.array([0, 1, 2])),
               (np.array([0, 3]), np.array([1, 0]))]

    losses = set_criterion_hoi(outputs, targets, indices,
                               num_obj_classes=num_obj_classes,
                               num_verb_classes=num_verb_classes,
                               eos_coef=0.1, alpha=0.5)
    losses = jax.tree_util.tree_map(jax.block_until_ready, losses)

    ref = set_criterion_hoi_ref(outputs, targets, indices,
                                num_obj_classes=num_obj_classes,
                                num_verb_classes=num_verb_classes,
                                eos_coef=0.1, alpha=0.5)
    for k in sorted(ref):
        assert jnp.allclose(losses[k], ref[k], atol=1e-4, rtol=1e-4), (k, losses[k], ref[k])

    print("KERNEL_OK")
</pallas_src>

<mosaic_0001>
module attributes {stable_mosaic.version = 11 : i64} {
  func.func @_criterion_kernel(%arg0: i32, %arg1: memref<1x8x128xf32, #tpu.memory_space<vmem>>, %arg2: memref<1x8x128xf32, #tpu.memory_space<vmem>>, %arg3: memref<1x8x1xf32, #tpu.memory_space<vmem>>, %arg4: memref<1x8x128xf32, #tpu.memory_space<vmem>>, %arg5: memref<1x8x128xf32, #tpu.memory_space<vmem>>, %arg6: memref<1x8x128xf32, #tpu.memory_space<vmem>>, %arg7: memref<1x8x128xf32, #tpu.memory_space<vmem>>, %arg8: memref<1x8x4xf32, #tpu.memory_space<vmem>>, %arg9: memref<1x8x4xf32, #tpu.memory_space<vmem>>, %arg10: memref<1x8x4xf32, #tpu.memory_space<vmem>>, %arg11: memref<1x8x4xf32, #tpu.memory_space<vmem>>, %arg12: memref<1x8x1xf32, #tpu.memory_space<vmem>>, %arg13: memref<1x128xf32, #tpu.memory_space<vmem>>) attributes {dimension_semantics = [#tpu.dimension_semantics<arbitrary>], iteration_bounds = array<i64: 2>, scalar_prefetch = 0 : i64, scratch_operands = 0 : i64, tpu.core_type = #tpu.core_type<tc>, window_params = [{transform_indices = @transform_0, window_bounds = array<i64: 1, 8, 128>}, {transform_indices = @transform_1, window_bounds = array<i64: 1, 8, 128>}, {transform_indices = @transform_2, window_bounds = array<i64: 1, 8, 1>}, {transform_indices = @transform_3, window_bounds = array<i64: 1, 8, 128>}, {transform_indices = @transform_4, window_bounds = array<i64: 1, 8, 128>}, {transform_indices = @transform_5, window_bounds = array<i64: 1, 8, 128>}, {transform_indices = @transform_6, window_bounds = array<i64: 1, 8, 128>}, {transform_indices = @transform_7, window_bounds = array<i64: 1, 8, 4>}, {transform_indices = @transform_8, window_bounds = array<i64: 1, 8, 4>}, {transform_indices = @transform_9, window_bounds = array<i64: 1, 8, 4>}, {transform_indices = @transform_10, window_bounds = array<i64: 1, 8, 4>}, {transform_indices = @transform_11, window_bounds = array<i64: 1, 8, 1>}, {pipeline_mode = #tpu.pipeline_mode<synchronous>, transform_indices = @transform_12, window_bounds = array<i64: 1, 128>}]} {
    %c0_i32 = arith.constant 0 : i32
    %0 = arith.cmpi eq, %arg0, %c0_i32 : i32
    %1 = arith.extui %0 : i1 to i32
    %c0_i32_0 = arith.constant 0 : i32
    %2 = arith.cmpi ne, %1, %c0_i32_0 : i32
    scf.if %2 {
      %cst_124 = arith.constant 0.000000e+00 : f32
      %439 = vector.broadcast %cst_124 : f32 to vector<1x128xf32>
      %c0_125 = arith.constant 0 : index
      %c0_126 = arith.constant 0 : index
      %440 = vector.load %arg13[%c0_125, %c0_126] : memref<1x128xf32, #tpu.memory_space<vmem>>, vector<1x128xf32>
      tpu.vector_store %arg13[%c0_125, %c0_126], %439 {strides = array<i32>} : memref<1x128xf32, #tpu.memory_space<vmem>>, vector<1x128xf32>,
    } else {
    }
    %c0 = arith.constant 0 : index
    %c0_1 = arith.constant 0 : index
    %c0_2 = arith.constant 0 : index
    %3 = vector.load %arg12[%c0, %c0_1, %c0_2] : memref<1x8x1xf32, #tpu.memory_space<vmem>>, vector<1x8x1xf32>
    %4 = vector.shape_cast %3 : vector<1x8x1xf32> to vector<8x1xf32>
    %c0_3 = arith.constant 0 : index
    %c0_4 = arith.constant 0 : index
    %c0_5 = arith.constant 0 : index
    %5 = vector.load %arg1[%c0_3, %c0_4, %c0_5] : memref<1x8x128xf32, #tpu.memory_space<vmem>>, vector<1x8x128xf32>
    %6 = vector.shape_cast %5 : vector<1x8x128xf32> to vector<8x128xf32>
    %c0_6 = arith.constant 0 : index
    %c0_7 = arith.constant 0 : index
    %c0_8 = arith.constant 0 : index
    %7 = vector.load %arg2[%c0_6, %c0_7, %c0_8] : memref<1x8x128xf32, #tpu.memory_space<vmem>>, vector<1x8x128xf32>
    %8 = vector.shape_cast %7 : vector<1x8x128xf32> to vector<8x128xf32>
    %c0_9 = arith.constant 0 : index
    %c0_10 = arith.constant 0 : index
    %c0_11 = arith.constant 0 : index
    %9 = vector.load %arg3[%c0_9, %c0_10, %c0_11] : memref<1x8x1xf32, #tpu.memory_space<vmem>>, vector<1x8x1xf32>
    %10 = vector.shape_cast %9 : vector<1x8x1xf32> to vector<8x1xf32>
    %cst = arith.constant dense<0xFF800000> : vector<8xf32>
    %11 = vector.multi_reduction <maximumf>, %6, %cst [1] : vector<8x128xf32> to vector<8xf32>
    %12 = vector.shape_cast %11 : vector<8xf32> to vector<8x1xf32>
    %13 = vector.broadcast %12 : vector<8x1xf32> to vector<8x128xf32>
    %14 = arith.subf %6, %13 : vector<8x128xf32>
    %15 = math.exp %14 : vector<8x128xf32>
    %cst_12 = arith.constant dense<0.000000e+00> : vector<8xf32>
    %16 = vector.multi_reduction <add>, %15, %cst_12 [1] : vector<8x128xf32> to vector<8xf32>
    %17 = vector.shape_cast %16 : vector<8xf32> to vector<8x1xf32>
    %18 = math.log %17 : vector<8x1xf32>
    %19 = arith.addf %12, %18 : vector<8x1xf32>
    %20 = arith.mulf %8, %6 : vector<8x128xf32>
    %cst_13 = arith.constant dense<0.000000e+00> : vector<8xf32>
    %21 = vector.multi_reduction <add>, %20, %cst_13 [1] : vector<8x128xf32> to vector<8xf32>
    %22 = vector.shape_cast %21 : vector<8xf32> to vector<8x1xf32>
    %23 = arith.subf %19, %22 : vector<8x1xf32>
    %24 = arith.mulf %10, %23 : vector<8x1xf32>
    %25 = vector.shape_cast %24 : vector<8x1xf32> to vector<1x8x1xf32>
    %cst_14 = arith.constant dense<0.000000e+00> : vector<1xf32>
    %26 = vector.multi_reduction <add>, %25, %cst_14 [1, 2] : vector<1x8x1xf32> to vector<1xf32>
    %27 = vector.shape_cast %26 : vector<1xf32> to vector<1x1x1xf32>
    %28 = vector.extract %27[0, 0, 0] : f32 from vector<1x1x1xf32>
    %29 = vector.shape_cast %10 : vector<8x1xf32> to vector<1x8x1xf32>
    %cst_15 = arith.constant dense<0.000000e+00> : vector<1xf32>
    %30 = vector.multi_reduction <add>, %29, %cst_15 [1, 2] : vector<1x8x1xf32> to vector<1xf32>
    %31 = vector.shape_cast %30 : vector<1xf32> to vector<1x1x1xf32>
    %32 = vector.extract %31[0, 0, 0] : f32 from vector<1x1x1xf32>
    %33 = arith.cmpf oge, %22, %12 : vector<8x1xf32>
    %34 = arith.extui %33 : vector<8x1xi1> to vector<8x1xi32>
    %35 = arith.sitofp %34 : vector<8x1xi32> to vector<8x1xf32>
    %36 = arith.mulf %4, %35 : vector<8x1xf32>
    %37 = vector.shape_cast %36 : vector<8x1xf32> to vector<1x8x1xf32>
    %cst_16 = arith.constant dense<0.000000e+00> : vector<1xf32>
    %38 = vector.multi_reduction <add>, %37, %cst_16 [1, 2] : vector<1x8x1xf32> to vector<1xf32>
    %39 = vector.shape_cast %38 : vector<1xf32> to vector<1x1x1xf32>
    %40 = vector.extract %39[0, 0, 0] : f32 from vector<1x1x1xf32>
    %41 = vector.shape_cast %4 : vector<8x1xf32> to vector<1x8x1xf32>
    %cst_17 = arith.constant dense<0.000000e+00> : vector<1xf32>
    %42 = vector.multi_reduction <add>, %41, %cst_17 [1, 2] : vector<1x8x1xf32> to vector<1xf32>
    %43 = vector.shape_cast %42 : vector<1xf32> to vector<1x1x1xf32>
    %44 = vector.extract %43[0, 0, 0] : f32 from vector<1x1x1xf32>
    %45 = tpu.iota {dimensions = array<i32: 1>} : vector<8x128xi32>
    %c4_i32 = arith.constant 4 : i32
    %46 = vector.broadcast %c4_i32 : i32 to vector<8x128xi32>
    %47 = arith.cmpi slt, %45, %46 : vector<8x128xi32>
    %cst_18 = arith.constant -1.000000e+09 : f32
    %48 = vector.broadcast %cst_18 : f32 to vector<8x128xf32>
    %49 = arith.select %47, %6, %48 : vector<8x128xi1>, vector<8x128xf32>
    %cst_19 = arith.constant dense<0xFF800000> : vector<8xf32>
    %50 = vector.multi_reduction <maximumf>, %49, %cst_19 [1] : vector<8x128xf32> to vector<8xf32>
    %51 = vector.shape_cast %50 : vector<8xf32> to vector<8x1xf32>
    %c4_i32_20 = arith.constant 4 : i32
    %52 = vector.broadcast %c4_i32_20 : i32 to vector<8x128xi32>
    %53 = arith.cmpi eq, %45, %52 : vector<8x128xi32>
    %cst_21 = arith.constant 0.000000e+00 : f32
    %54 = vector.broadcast %cst_21 : f32 to vector<8x128xf32>
    %55 = arith.select %53, %6, %54 : vector<8x128xi1>, vector<8x128xf32>
    %cst_22 = arith.constant dense<0.000000e+00> : vector<8xf32>
    %56 = vector.multi_reduction <add>, %55, %cst_22 [1] : vector<8x128xf32> to vector<8xf32>
    %57 = vector.shape_cast %56 : vector<8xf32> to vector<8x1xf32>
    %58 = arith.cmpf oge, %51, %57 : vector<8x1xf32>
    %59 = arith.extui %58 : vector<8x1xi1> to vector<8x1xi32>
    %60 = arith.sitofp %59 : vector<8x1xi32> to vector<8x1xf32>
    %61 = vector.shape_cast %60 : vector<8x1xf32> to vector<1x8x1xf32>
    %cst_23 = arith.constant dense<0.000000e+00> : vector<1xf32>
    %62 = vector.multi_reduction <add>, %61, %cst_23 [1, 2] : vector<1x8x1xf32> to vector<1xf32>
    %63 = vector.shape_cast %62 : vector<1xf32> to vector<1x1x1xf32>
    %64 = vector.extract %63[0, 0, 0] : f32 from vector<1x1x1xf32>
    %65 = arith.subf %64, %44 : f32
    %66 = math.absf %65 : f32
    %c0_24 = arith.constant 0 : index
    %c0_25 = arith.constant 0 : index
    %c0_26 = arith.constant 0 : index
    %67 = vector.load %arg6[%c0_24, %c0_25, %c0_26] : memref<1x8x128xf32, #tpu.memory_space<vmem>>, vector<1x8x128xf32>
    %68 = vector.shape_cast %67 : vector<1x8x128xf32> to vector<8x128xf32>
    %c0_27 = arith.constant 0 : index
    %c0_28 = arith.constant 0 : index
    %c0_29 = arith.constant 0 : index
    %69 = vector.load %arg7[%c0_27, %c0_28, %c0_29] : memref<1x8x128xf32, #tpu.memory_space<vmem>>, vector<1x8x128xf32>
    %70 = vector.shape_cast %69 : vector<1x8x128xf32> to vector<8x128xf32>
    %cst_30 = arith.constant dense<0xFF800000> : vector<8xf32>
    %71 = vector.multi_reduction <maximumf>, %68, %cst_30 [1] : vector<8x128xf32> to vector<8xf32>
    %72 = vector.shape_cast %71 : vector<8xf32> to vector<8x1xf32>
    %73 = vector.broadcast %72 : vector<8x1xf32> to vector<8x128xf32>
    %74 = arith.subf %68, %73 : vector<8x128xf32>
    %75 = math.exp %74 : vector<8x128xf32>
    %cst_31 = arith.constant dense<0.000000e+00> : vector<8xf32>
    %76 = vector.multi_reduction <add>, %75, %cst_31 [1] : vector<8x128xf32> to vector<8xf32>
    %77 = vector.shape_cast %76 : vector<8xf32> to vector<8x1xf32>
    %78 = math.log %77 : vector<8x1xf32>
    %79 = arith.addf %72, %78 : vector<8x1xf32>
    %80 = arith.mulf %70, %68 : vector<8x128xf32>
    %cst_32 = arith.constant dense<0.000000e+00> : vector<8xf32>
    %81 = vector.multi_reduction <add>, %80, %cst_32 [1] : vector<8x128xf32> to vector<8xf32>
    %82 = vector.shape_cast %81 : vector<8xf32> to vector<8x1xf32>
    %83 = arith.subf %79, %82 : vector<8x1xf32>
    %84 = vector.shape_cast %83 : vector<8x1xf32> to vector<1x8x1xf32>
    %cst_33 = arith.constant dense<0.000000e+00> : vector<1xf32>
    %85 = vector.multi_reduction <add>, %84, %cst_33 [1, 2] : vector<1x8x1xf32> to vector<1xf32>
    %86 = vector.shape_cast %85 : vector<1xf32> to vector<1x1x1xf32>
    %87 = vector.extract %86[0, 0, 0] : f32 from vector<1x1x1xf32>
    %88 = arith.cmpf oge, %82, %72 : vector<8x1xf32>
    %89 = arith.extui %88 : vector<8x1xi1> to vector<8x1xi32>
    %90 = arith.sitofp %89 : vector<8x1xi32> to vector<8x1xf32>
    %91 = arith.mulf %4, %90 : vector<8x1xf32>
    %92 = vector.shape_cast %91 : vector<8x1xf32> to vector<1x8x1xf32>
    %cst_34 = arith.constant dense<0.000000e+00> : vector<1xf32>
    %93 = vector.multi_reduction <add>, %92, %cst_34 [1, 2] : vector<1x8x1xf32> to vector<1xf32>
    %94 = vector.shape_cast %93 : vector<1xf32> to vector<1x1x1xf32>
    %95 = vector.extract %94[0, 0, 0] : f32 from vector<1x1x1xf32>
    %c0_35 = arith.constant 0 : index
    %c0_36 = arith.constant 0 : index
    %c0_37 = arith.constant 0 : index
    %96 = vector.load %arg4[%c0_35, %c0_36, %c0_37] : memref<1x8x128xf32, #tpu.memory_space<vmem>>, vector<1x8x128xf32>
    %97 = vector.shape_cast %96 : vector<1x8x128xf32> to vector<8x128xf32>
    %c0_38 = arith.constant 0 : index
    %c0_39 = arith.constant 0 : index
    %c0_40 = arith.constant 0 : index
    %98 = vector.load %arg5[%c0_38, %c0_39, %c0_40] : memref<1x8x128xf32, #tpu.memory_space<vmem>>, vector<1x8x128xf32>
    %99 = vector.shape_cast %98 : vector<1x8x128xf32> to vector<8x128xf32>
    %100 = tpu.iota {dimensions = array<i32: 1>} : vector<8x128xi32>
    %c8_i32 = arith.constant 8 : i32
    %101 = vector.broadcast %c8_i32 : i32 to vector<8x128xi32>
    %102 = arith.cmpi slt, %100, %101 : vector<8x128xi32>
    %103 = arith.negf %97 : vector<8x128xf32>
    %104 = math.exp %103 : vector<8x128xf32>
    %cst_41 = arith.constant 1.000000e+00 : f32
    %105 = vector.broadcast %cst_41 : f32 to vector<8x128xf32>
    %106 = arith.addf %105, %104 : vector<8x128xf32>
    %107 = arith.divf %105, %106 : vector<8x128xf32>
    %cst_42 = arith.constant 1.000000e+00 : f32
    %108 = vector.broadcast %cst_42 : f32 to vector<8x128xf32>
    %109 = arith.cmpf oeq, %99, %108 : vector<8x128xf32>
    %110 = arith.andi %102, %109 : vector<8x128xi1>
    %cst_43 = arith.constant 0.000000e+00 : f32
    %111 = vector.broadcast %cst_43 : f32 to vector<8x128xf32>
    %112 = arith.cmpf oeq, %99, %111 : vector<8x128xf32>
    %113 = arith.andi %102, %112 : vector<8x128xi1>
    %cst_44 = arith.constant 0.000000e+00 : f32
    %114 = vector.broadcast %cst_44 : f32 to vector<8x128xf32>
    %115 = arith.cmpf ogt, %99, %114 : vector<8x128xf32>
    %cst_45 = arith.constant 1.000000e+00 : f32
    %116 = vector.broadcast %cst_45 : f32 to vector<8x128xf32>
    %117 = arith.cmpf olt, %99, %116 : vector<8x128xf32>
    %118 = arith.andi %115, %117 : vector<8x128xi1>
    %119 = arith.andi %102, %118 : vector<8x128xi1>
    %120 = math.log %107 : vector<8x128xf32>
    %cst_46 = arith.constant 1.000000e+00 : f32
    %121 = vector.broadcast %cst_46 : f32 to vector<8x128xf32>
    %122 = arith.subf %121, %107 : vector<8x128xf32>
    %123 = math.log %122 : vector<8x128xf32>
    %cst_47 = arith.constant 5.000000e-01 : f32
    %124 = vector.broadcast %cst_47 : f32 to vector<8x128xf32>
    %125 = arith.mulf %124, %120 : vector<8x128xf32>
    %cst_48 = arith.constant 1.000000e+00 : f32
    %126 = vector.broadcast %cst_48 : f32 to vector<8x128xf32>
    %127 = arith.subf %126, %107 : vector<8x128xf32>
    %128 = arith.mulf %127, %127 : vector<8x128xf32>
    %129 = arith.mulf %125, %128 : vector<8x128xf32>
    %cst_49 = arith.constant 0.000000e+00 : f32
    %130 = vector.broadcast %cst_49 : f32 to vector<8x128xf32>
    %131 = arith.select %110, %129, %130 : vector<8x128xi1>, vector<8x128xf32>
    %cst_50 = arith.constant 5.000000e-01 : f32
    %132 = vector.broadcast %cst_50 : f32 to vector<8x128xf32>
    %133 = arith.mulf %132, %123 : vector<8x128xf32>
    %134 = arith.mulf %107, %107 : vector<8x128xf32>
    %135 = arith.mulf %133, %134 : vector<8x128xf32>
    %cst_51 = arith.constant 0.000000e+00 : f32
    %136 = vector.broadcast %cst_51 : f32 to vector<8x128xf32>
    %137 = arith.select %113, %135, %136 : vector<8x128xi1>, vector<8x128xf32>
    %138 = arith.mulf %99, %120 : vector<8x128xf32>
    %cst_52 = arith.constant 1.000000e+00 : f32
    %139 = vector.broadcast %cst_52 : f32 to vector<8x128xf32>
    %140 = arith.subf %139, %99 : vector<8x128xf32>
    %141 = arith.mulf %140, %123 : vector<8x128xf32>
    %142 = arith.addf %138, %141 : vector<8x128xf32>
    %cst_53 = arith.constant 0.000000e+00 : f32
    %143 = vector.broadcast %cst_53 : f32 to vector<8x128xf32>
    %144 = arith.subf %143, %142 : vector<8x128xf32>
    %cst_54 = arith.constant 0.000000e+00 : f32
    %145 = vector.broadcast %cst_54 : f32 to vector<8x128xf32>
    %146 = arith.select %119, %144, %145 : vector<8x128xi1>, vector<8x128xf32>
    %147 = vector.shape_cast %131 : vector<8x128xf32> to vector<1x8x128xf32>
    %cst_55 = arith.constant dense<0.000000e+00> : vector<1xf32>
    %148 = vector.multi_reduction <add>, %147, %cst_55 [1, 2] : vector<1x8x128xf32> to vector<1xf32>
    %149 = vector.shape_cast %148 : vector<1xf32> to vector<1x1x1xf32>
    %150 = vector.extract %149[0, 0, 0] : f32 from vector<1x1x1xf32>
    %151 = vector.shape_cast %137 : vector<8x128xf32> to vector<1x8x128xf32>
    %cst_56 = arith.constant dense<0.000000e+00> : vector<1xf32>
    %152 = vector.multi_reduction <add>, %151, %cst_56 [1, 2] : vector<1x8x128xf32> to vector<1xf32>
    %153 = vector.shape_cast %152 : vector<1xf32> to vector<1x1x1xf32>
    %154 = vector.extract %153[0, 0, 0] : f32 from vector<1x1x1xf32>
    %155 = arith.extui %110 : vector<8x128xi1> to vector<8x128xi32>
    %156 = arith.sitofp %155 : vector<8x128xi32> to vector<8x128xf32>
    %157 = vector.shape_cast %156 : vector<8x128xf32> to vector<1x8x128xf32>
    %cst_57 = arith.constant dense<0.000000e+00> : vector<1xf32>
    %158 = vector.multi_reduction <add>, %157, %cst_57 [1, 2] : vector<1x8x128xf32> to vector<1xf32>
    %159 = vector.shape_cast %158 : vector<1xf32> to vector<1x1x1xf32>
    %160 = vector.extract %159[0, 0, 0] : f32 from vector<1x1x1xf32>
    %161 = vector.shape_cast %146 : vector<8x128xf32> to vector<1x8x128xf32>
    %cst_58 = arith.constant dense<0.000000e+00> : vector<1xf32>
    %162 = vector.multi_reduction <add>, %161, %cst_58 [1, 2] : vector<1x8x128xf32> to vector<1xf32>
    %163 = vector.shape_cast %162 : vector<1xf32> to vector<1x1x1xf32>
    %164 = vector.extract %163[0, 0, 0] : f32 from vector<1x1x1xf32>
    %c0_59 = arith.constant 0 : index
    %c0_60 = arith.constant 0 : index
    %c0_61 = arith.constant 0 : index
    %165 = vector.load %arg8[%c0_59, %c0_60, %c0_61] : memref<1x8x4xf32, #tpu.memory_space<vmem>>, vector<1x8x4xf32>
    %166 = vector.shape_cast %165 : vector<1x8x4xf32> to vector<8x4xf32>
    %c0_62 = arith.constant 0 : index
    %c0_63 = arith.constant 0 : index
    %c0_64 = arith.constant 0 : index
    %167 = vector.load %arg9[%c0_62, %c0_63, %c0_64] : memref<1x8x4xf32, #tpu.memory_space<vmem>>, vector<1x8x4xf32>
    %168 = vector.shape_cast %167 : vector<1x8x4xf32> to vector<8x4xf32>
    %c0_65 = arith.constant 0 : index
    %c0_66 = arith.constant 0 : index
    %c0_67 = arith.constant 0 : index
    %169 = vector.load %arg10[%c0_65, %c0_66, %c0_67] : memref<1x8x4xf32, #tpu.memory_space<vmem>>, vector<1x8x4xf32>
    %170 = vector.shape_cast %169 : vector<1x8x4xf32> to vector<8x4xf32>
    %c0_68 = arith.constant 0 : index
    %c0_69 = arith.constant 0 : index
    %c0_70 = arith.constant 0 : index
    %171 = vector.load %arg11[%c0_68, %c0_69, %c0_70] : memref<1x8x4xf32, #tpu.memory_space<vmem>>, vector<1x8x4xf32>
    %172 = vector.shape_cast %171 : vector<1x8x4xf32> to vector<8x4xf32>
    %cst_71 = arith.constant 0.000000e+00 : f32
    %173 = vector.broadcast %cst_71 : f32 to vector<8x4xf32>
    %174 = arith.cmpf one, %172, %173 : vector<8x4xf32>
    %175 = arith.extui %174 : vector<8x4xi1> to vector<8x4xi32>
    %176 = arith.sitofp %175 : vector<8x4xi32> to vector<8x4xf32>
    %cst_72 = arith.constant dense<0xFF800000> : vector<8xf32>
    %177 = vector.multi_reduction <maximumf>, %176, %cst_72 [1] : vector<8x4xf32> to vector<8xf32>
    %178 = vector.shape_cast %177 : vector<8xf32> to vector<8x1xf32>
    %179 = arith.mulf %4, %178 : vector<8x1xf32>
    %180 = arith.subf %166, %170 : vector<8x4xf32>
    %181 = math.absf %180 : vector<8x4xf32>
    %182 = vector.broadcast %4 : vector<8x1xf32> to vector<8x4xf32>
    %183 = arith.mulf %182, %181 : vector<8x4xf32>
    %184 = vector.shape_cast %183 : vector<8x4xf32> to vector<1x8x4xf32>
    %cst_73 = arith.constant dense<0.000000e+00> : vector<1xf32>
    %185 = vector.multi_reduction <add>, %184, %cst_73 [1, 2] : vector<1x8x4xf32> to vector<1xf32>
    %186 = vector.shape_cast %185 : vector<1xf32> to vector<1x1x1xf32>
    %187 = vector.extract %186[0, 0, 0] : f32 from vector<1x1x1xf32>
    %188 = arith.subf %168, %172 : vector<8x4xf32>
    %189 = math.absf %188 : vector<8x4xf32>
    %190 = vector.broadcast %179 : vector<8x1xf32> to vector<8x4xf32>
    %191 = arith.mulf %190, %189 : vector<8x4xf32>
    %192 = vector.shape_cast %191 : vector<8x4xf32> to vector<1x8x4xf32>
    %cst_74 = arith.constant dense<0.000000e+00> : vector<1xf32>
    %193 = vector.multi_reduction <add>, %192, %cst_74 [1, 2] : vector<1x8x4xf32> to vector<1xf32>
    %194 = vector.shape_cast %193 : vector<1xf32> to vector<1x1x1xf32>
    %195 = vector.extract %194[0, 0, 0] : f32 from vector<1x1x1xf32>
    %196 = vector.extract_strided_slice %166 {offsets = [0, 0], sizes = [8, 1], strides = [1, 1]} : vector<8x4xf32> to vector<8x1xf32>
    %197 = vector.extract_strided_slice %166 {offsets = [0, 1], sizes = [8, 1], strides = [1, 1]} : vector<8x4xf32> to vector<8x1xf32>
    %198 = vector.extract_strided_slice %166 {offsets = [0, 2], sizes = [8, 1], strides = [1, 1]} : vector<8x4xf32> to vector<8x1xf32>
    %199 = vector.extract_strided_slice %166 {offsets = [0, 3], sizes = [8, 1], strides = [1, 1]} : vector<8x4xf32> to vector<8x1xf32>
    %cst_75 = arith.constant 5.000000e-01 : f32
    %200 = vector.broadcast %cst_75 : f32 to vector<8x1xf32>
    %201 = arith.mulf %200, %198 : vector<8x1xf32>
    %202 = arith.subf %196, %201 : vector<8x1xf32>
    %cst_76 = arith.constant 5.000000e-01 : f32
    %203 = vector.broadcast %cst_76 : f32 to vector<8x1xf32>
    %204 = arith.mulf %203, %199 : vector<8x1xf32>
    %205 = arith.subf %197, %204 : vector<8x1xf32>
    %cst_77 = arith.constant 5.000000e-01 : f32
    %206 = vector.broadcast %cst_77 : f32 to vector<8x1xf32>
    %207 = arith.mulf %206, %198 : vector<8x1xf32>
    %208 = arith.addf %196, %207 : vector<8x1xf32>
    %cst_78 = arith.constant 5.000000e-01 : f32
    %209 = vector.broadcast %cst_78 : f32 to vector<8x1xf32>
    %210 = arith.mulf %209, %199 : vector<8x1xf32>
    %211 = arith.addf %197, %210 : vector<8x1xf32>
    %212 = vector.extract_strided_slice %170 {offsets = [0, 0], sizes = [8, 1], strides = [1, 1]} : vector<8x4xf32> to vector<8x1xf32>
    %213 = vector.extract_strided_slice %170 {offsets = [0, 1], sizes = [8, 1], strides = [1, 1]} : vector<8x4xf32> to vector<8x1xf32>
    %214 = vector.extract_strided_slice %170 {offsets = [0, 2], sizes = [8, 1], strides = [1, 1]} : vector<8x4xf32> to vector<8x1xf32>
    %215 = vector.extract_strided_slice %170 {offsets = [0, 3], sizes = [8, 1], strides = [1, 1]} : vector<8x4xf32> to vector<8x1xf32>
    %cst_79 = arith.constant 5.000000e-01 : f32
    %216 = vector.broadcast %cst_79 : f32 to vector<8x1xf32>
    %217 = arith.mulf %216, %214 : vector<8x1xf32>
    %218 = arith.subf %212, %217 : vector<8x1xf32>
    %cst_80 = arith.constant 5.000000e-01 : f32
    %219 = vector.broadcast %cst_80 : f32 to vector<8x1xf32>
    %220 = arith.mulf %219, %215 : vector<8x1xf32>
    %221 = arith.subf %213, %220 : vector<8x1xf32>
    %cst_81 = arith.constant 5.000000e-01 : f32
    %222 = vector.broadcast %cst_81 : f32 to vector<8x1xf32>
    %223 = arith.mulf %222, %214 : vector<8x1xf32>
    %224 = arith.addf %212, %223 : vector<8x1xf32>
    %cst_82 = arith.constant 5.000000e-01 : f32
    %225 = vector.broadcast %cst_82 : f32 to vector<8x1xf32>
    %226 = arith.mulf %225, %215 : vector<8x1xf32>
    %227 = arith.addf %213, %226 : vector<8x1xf32>
    %228 = arith.subf %208, %202 : vector<8x1xf32>
    %229 = arith.subf %211, %205 : vector<8x1xf32>
    %230 = arith.mulf %228, %229 : vector<8x1xf32>
    %231 = arith.subf %224, %218 : vector<8x1xf32>
    %232 = arith.subf %227, %221 : vector<8x1xf32>
    %233 = arith.mulf %231, %232 : vector<8x1xf32>
    %234 = arith.minimumf %208, %224 : vector<8x1xf32>
    %235 = arith.maximumf %202, %218 : vector<8x1xf32>
    %236 = arith.subf %234, %235 : vector<8x1xf32>
    %cst_83 = arith.constant 0.000000e+00 : f32
    %237 = vector.broadcast %cst_83 : f32 to vector<8x1xf32>
    %238 = arith.maximumf %236, %237 : vector<8x1xf32>
    %239 = arith.minimumf %211, %227 : vector<8x1xf32>
    %240 = arith.maximumf %205, %221 : vector<8x1xf32>
    %241 = arith.subf %239, %240 : vector<8x1xf32>
    %cst_84 = arith.constant 0.000000e+00 : f32
    %242 = vector.broadcast %cst_84 : f32 to vector<8x1xf32>
    %243 = arith.maximumf %241, %242 : vector<8x1xf32>
    %244 = arith.mulf %238, %243 : vector<8x1xf32>
    %245 = arith.addf %230, %233 : vector<8x1xf32>
    %246 = arith.subf %245, %244 : vector<8x1xf32>
    %247 = arith.divf %244, %246 : vector<8x1xf32>
    %248 = arith.maximumf %208, %224 : vector<8x1xf32>
    %249 = arith.minimumf %202, %218 : vector<8x1xf32>
    %250 = arith.subf %248, %249 : vector<8x1xf32>
    %251 = arith.maximumf %211, %227 : vector<8x1xf32>
    %252 = arith.minimumf %205, %221 : vector<8x1xf32>
    %253 = arith.subf %251, %252 : vector<8x1xf32>
    %254 = arith.mulf %250, %253 : vector<8x1xf32>
    %255 = arith.subf %254, %246 : vector<8x1xf32>
    %256 = arith.divf %255, %254 : vector<8x1xf32>
    %257 = arith.subf %247, %256 : vector<8x1xf32>
    %cst_85 = arith.constant 1.000000e+00 : f32
    %258 = vector.broadcast %cst_85 : f32 to vector<8x1xf32>
    %259 = arith.subf %258, %257 : vector<8x1xf32>
    %260 = arith.mulf %4, %259 : vector<8x1xf32>
    %261 = vector.shape_cast %260 : vector<8x1xf32> to vector<1x8x1xf32>
    %cst_86 = arith.constant dense<0.000000e+00> : vector<1xf32>
    %262 = vector.multi_reduction <add>, %261, %cst_86 [1, 2] : vector<1x8x1xf32> to vector<1xf32>
    %263 = vector.shape_cast %262 : vector<1xf32> to vector<1x1x1xf32>
    %264 = vector.extract %263[0, 0, 0] : f32 from vector<1x1x1xf32>
    %265 = vector.extract_strided_slice %168 {offsets = [0, 0], sizes = [8, 1], strides = [1, 1]} : vector<8x4xf32> to vector<8x1xf32>
    %266 = vector.extract_strided_slice %168 {offsets = [0, 1], sizes = [8, 1], strides = [1, 1]} : vector<8x4xf32> to vector<8x1xf32>
    %267 = vector.extract_strided_slice %168 {offsets = [0, 2], sizes = [8, 1], strides = [1, 1]} : vector<8x4xf32> to vector<8x1xf32>
    %268 = vector.extract_strided_slice %168 {offsets = [0, 3], sizes = [8, 1], strides = [1, 1]} : vector<8x4xf32> to vector<8x1xf32>
    %cst_87 = arith.constant 5.000000e-01 : f32
    %269 = vector.broadcast %cst_87 : f32 to vector<8x1xf32>
    %270 = arith.mulf %269, %267 : vector<8x1xf32>
    %271 = arith.subf %265, %270 : vector<8x1xf32>
    %cst_88 = arith.constant 5.000000e-01 : f32
    %272 = vector.broadcast %cst_88 : f32 to vector<8x1xf32>
    %273 = arith.mulf %272, %268 : vector<8x1xf32>
    %274 = arith.subf %266, %273 : vector<8x1xf32>
    %cst_89 = arith.constant 5.000000e-01 : f32
    %275 = vector.broadcast %cst_89 : f32 to vector<8x1xf32>
    %276 = arith.mulf %275, %267 : vector<8x1xf32>
    %277 = arith.addf %265, %276 : vector<8x1xf32>
    %cst_90 = arith.constant 5.000000e-01 : f32
    %278 = vector.broadcast %cst_90 : f32 to vector<8x1xf32>
    %279 = arith.mulf %278, %268 : vector<8x1xf32>
    %280 = arith.addf %266, %279 : vector<8x1xf32>
    %281 = vector.extract_strided_slice %172 {offsets = [0, 0], sizes = [8, 1], strides = [1, 1]} : vector<8x4xf32> to vector<8x1xf32>
    %282 = vector.extract_strided_slice %172 {offsets = [0, 1], sizes = [8, 1], strides = [1, 1]} : vector<8x4xf32> to vector<8x1xf32>
    %283 = vector.extract_strided_slice %172 {offsets = [0, 2], sizes = [8, 1], strides = [1, 1]} : vector<8x4xf32> to vector<8x1xf32>
    %284 = vector.extract_strided_slice %172 {offsets = [0, 3], sizes = [8, 1], strides = [1, 1]} : vector<8x4xf32> to vector<8x1xf32>
    %cst_91 = arith.constant 5.000000e-01 : f32
    %285 = vector.broadcast %cst_91 : f32 to vector<8x1xf32>
    %286 = arith.mulf %285, %283 : vector<8x1xf32>
    %287 = arith.subf %281, %286 : vector<8x1xf32>
    %cst_92 = arith.constant 5.000000e-01 : f32
    %288 = vector.broadcast %cst_92 : f32 to vector<8x1xf32>
    %289 = arith.mulf %288, %284 : vector<8x1xf32>
    %290 = arith.subf %282, %289 : vector<8x1xf32>
    %cst_93 = arith.constant 5.000000e-01 : f32
    %291 = vector.broadcast %cst_93 : f32 to vector<8x1xf32>
    %292 = arith.mulf %291, %283 : vector<8x1xf32>
    %293 = arith.addf %281, %292 : vector<8x1xf32>
    %cst_94 = arith.constant 5.000000e-01 : f32
    %294 = vector.broadcast %cst_94 : f32 to vector<8x1xf32>
    %295 = arith.mulf %294, %284 : vector<8x1xf32>
    %296 = arith.addf %282, %295 : vector<8x1xf32>
    %297 = arith.subf %277, %271 : vector<8x1xf32>
    %298 = arith.subf %280, %274 : vector<8x1xf32>
    %299 = arith.mulf %297, %298 : vector<8x1xf32>
    %300 = arith.subf %293, %287 : vector<8x1xf32>
    %301 = arith.subf %296, %290 : vector<8x1xf32>
    %302 = arith.mulf %300, %301 : vector<8x1xf32>
    %303 = arith.minimumf %277, %293 : vector<8x1xf32>
    %304 = arith.maximumf %271, %287 : vector<8x1xf32>
    %305 = arith.subf %303, %304 : vector<8x1xf32>
    %cst_95 = arith.constant 0.000000e+00 : f32
    %306 = vector.broadcast %cst_95 : f32 to vector<8x1xf32>
    %307 = arith.maximumf %305, %306 : vector<8x1xf32>
    %308 = arith.minimumf %280, %296 : vector<8x1xf32>
    %309 = arith.maximumf %274, %290 : vector<8x1xf32>
    %310 = arith.subf %308, %309 : vector<8x1xf32>
    %cst_96 = arith.constant 0.000000e+00 : f32
    %311 = vector.broadcast %cst_96 : f32 to vector<8x1xf32>
    %312 = arith.maximumf %310, %311 : vector<8x1xf32>
    %313 = arith.mulf %307, %312 : vector<8x1xf32>
    %314 = arith.addf %299, %302 : vector<8x1xf32>
    %315 = arith.subf %314, %313 : vector<8x1xf32>
    %316 = arith.divf %313, %315 : vector<8x1xf32>
    %317 = arith.maximumf %277, %293 : vector<8x1xf32>
    %318 = arith.minimumf %271, %287 : vector<8x1xf32>
    %319 = arith.subf %317, %318 : vector<8x1xf32>
    %320 = arith.maximumf %280, %296 : vector<8x1xf32>
    %321 = arith.minimumf %274, %290 : vector<8x1xf32>
    %322 = arith.subf %320, %321 : vector<8x1xf32>
    %323 = arith.mulf %319, %322 : vector<8x1xf32>
    %324 = arith.subf %323, %315 : vector<8x1xf32>
    %325 = arith.divf %324, %323 : vector<8x1xf32>
    %326 = arith.subf %316, %325 : vector<8x1xf32>
    %cst_97 = arith.constant 1.000000e+00 : f32
    %327 = vector.broadcast %cst_97 : f32 to vector<8x1xf32>
    %328 = arith.subf %327, %326 : vector<8x1xf32>
    %329 = arith.mulf %179, %328 : vector<8x1xf32>
    %330 = vector.shape_cast %329 : vector<8x1xf32> to vector<1x8x1xf32>
    %cst_98 = arith.constant dense<0.000000e+00> : vector<1xf32>
    %331 = vector.multi_reduction <add>, %330, %cst_98 [1, 2] : vector<1x8x1xf32> to vector<1xf32>
    %332 = vector.shape_cast %331 : vector<1xf32> to vector<1x1x1xf32>
    %333 = vector.extract %332[0, 0, 0] : f32 from vector<1x1x1xf32>
    %334 = vector.shape_cast %179 : vector<8x1xf32> to vector<1x8x1xf32>
    %cst_99 = arith.constant dense<0.000000e+00> : vector<1xf32>
    %335 = vector.multi_reduction <add>, %334, %cst_99 [1, 2] : vector<1x8x1xf32> to vector<1xf32>
    %336 = vector.shape_cast %335 : vector<1xf32> to vector<1x1x1xf32>
    %337 = vector.extract %336[0, 0, 0] : f32 from vector<1x1x1xf32>
    %338 = tpu.iota {dimensions = array<i32: 1>} : vector<1x128xi32>
    %cst_100 = arith.constant 0.000000e+00 : f32
    %339 = vector.broadcast %cst_100 : f32 to vector<1x128xf32>
    %c0_i32_101 = arith.constant 0 : i32
    %340 = vector.broadcast %c0_i32_101 : i32 to vector<1x128xi32>
    %341 = arith.cmpi eq, %338, %340 : vector<1x128xi32>
    %cst_102 = arith.constant 0.000000e+00 : f32
    %342 = vector.broadcast %28 : f32 to vector<1x128xf32>
    %343 = vector.broadcast %cst_102 : f32 to vector<1x128xf32>
    %344 = arith.select %341, %342, %343 : vector<1x128xi1>, vector<1x128xf32>
    %345 = arith.addf %339, %344 : vector<1x128xf32>
    %c1_i32 = arith.constant 1 : i32
    %346 = vector.broadcast %c1_i32 : i32 to vector<1x128xi32>
    %347 = arith.cmpi eq, %338, %346 : vector<1x128xi32>
    %cst_103 = arith.constant 0.000000e+00 : f32
    %348 = vector.broadcast %32 : f32 to vector<1x128xf32>
    %349 = vector.broadcast %cst_103 : f32 to vector<1x128xf32>
    %350 = arith.select %347, %348, %349 : vector<1x128xi1>, vector<1x128xf32>
    %351 = arith.addf %345, %350 : vector<1x128xf32>
    %c2_i32 = arith.constant 2 : i32
    %352 = vector.broadcast %c2_i32 : i32 to vector<1x128xi32>
    %353 = arith.cmpi eq, %338, %352 : vector<1x128xi32>
    %cst_104 = arith.constant 0.000000e+00 : f32
    %354 = vector.broadcast %66 : f32 to vector<1x128xf32>
    %355 = vector.broadcast %cst_104 : f32 to vector<1x128xf32>
    %356 = arith.select %353, %354, %355 : vector<1x128xi1>, vector<1x128xf32>
    %357 = arith.addf %351, %356 : vector<1x128xf32>
    %c3_i32 = arith.constant 3 : i32
    %358 = vector.broadcast %c3_i32 : i32 to vector<1x128xi32>
    %359 = arith.cmpi eq, %338, %358 : vector<1x128xi32>
    %cst_105 = arith.constant 0.000000e+00 : f32
    %360 = vector.broadcast %87 : f32 to vector<1x128xf32>
    %361 = vector.broadcast %cst_105 : f32 to vector<1x128xf32>
    %362 = arith.select %359, %360, %361 : vector<1x128xi1>, vector<1x128xf32>
    %363 = arith.addf %357, %362 : vector<1x128xf32>
    %c4_i32_106 = arith.constant 4 : i32
    %364 = vector.broadcast %c4_i32_106 : i32 to vector<1x128xi32>
    %365 = arith.cmpi eq, %338, %364 : vector<1x128xi32>
    %cst_107 = arith.constant 0.000000e+00 : f32
    %366 = vector.broadcast %150 : f32 to vector<1x128xf32>
    %367 = vector.broadcast %cst_107 : f32 to vector<1x128xf32>
    %368 = arith.select %365, %366, %367 : vector<1x128xi1>, vector<1x128xf32>
    %369 = arith.addf %363, %368 : vector<1x128xf32>
    %c5_i32 = arith.constant 5 : i32
    %370 = vector.broadcast %c5_i32 : i32 to vector<1x128xi32>
    %371 = arith.cmpi eq, %338, %370 : vector<1x128xi32>
    %cst_108 = arith.constant 0.000000e+00 : f32
    %372 = vector.broadcast %154 : f32 to vector<1x128xf32>
    %373 = vector.broadcast %cst_108 : f32 to vector<1x128xf32>
    %374 = arith.select %371, %372, %373 : vector<1x128xi1>, vector<1x128xf32>
    %375 = arith.addf %369, %374 : vector<1x128xf32>
    %c6_i32 = arith.constant 6 : i32
    %376 = vector.broadcast %c6_i32 : i32 to vector<1x128xi32>
    %377 = arith.cmpi eq, %338, %376 : vector<1x128xi32>
    %cst_109 = arith.constant 0.000000e+00 : f32
    %378 = vector.broadcast %160 : f32 to vector<1x128xf32>
    %379 = vector.broadcast %cst_109 : f32 to vector<1x128xf32>
    %380 = arith.select %377, %378, %379 : vector<1x128xi1>, vector<1x128xf32>
    %381 = arith.addf %375, %380 : vector<1x128xf32>
    %c7_i32 = arith.constant 7 : i32
    %382 = vector.broadcast %c7_i32 : i32 to vector<1x128xi32>
    %383 = arith.cmpi eq, %338, %382 : vector<1x128xi32>
    %cst_110 = arith.constant 0.000000e+00 : f32
    %384 = vector.broadcast %164 : f32 to vector<1x128xf32>
    %385 = vector.broadcast %cst_110 : f32 to vector<1x128xf32>
    %386 = arith.select %383, %384, %385 : vector<1x128xi1>, vector<1x128xf32>
    %387 = arith.addf %381, %386 : vector<1x128xf32>
    %c8_i32_111 = arith.constant 8 : i32
    %388 = vector.broadcast %c8_i32_111 : i32 to vector<1x128xi32>
    %389 = arith.cmpi eq, %338, %388 : vector<1x128xi32>
    %cst_112 = arith.constant 0.000000e+00 : f32
    %390 = vector.broadcast %187 : f32 to vector<1x128xf32>
    %391 = vector.broadcast %cst_112 : f32 to vector<1x128xf32>
    %392 = arith.select %389, %390, %391 : vector<1x128xi1>, vector<1x128xf32>
    %393 = arith.addf %387, %392 : vector<1x128xf32>
    %c9_i32 = arith.constant 9 : i32
    %394 = vector.broadcast %c9_i32 : i32 to vector<1x128xi32>
    %395 = arith.cmpi eq, %338, %394 : vector<1x128xi32>
    %cst_113 = arith.constant 0.000000e+00 : f32
    %396 = vector.broadcast %195 : f32 to vector<1x128xf32>
    %397 = vector.broadcast %cst_113 : f32 to vector<1x128xf32>
    %398 = arith.select %395, %396, %397 : vector<1x128xi1>, vector<1x128xf32>
    %399 = arith.addf %393, %398 : vector<1x128xf32>
    %c10_i32 = arith.constant 10 : i32
    %400 = vector.broadcast %c10_i32 : i32 to vector<1x128xi32>
    %401 = arith.cmpi eq, %338, %400 : vector<1x128xi32>
    %cst_114 = arith.constant 0.000000e+00 : f32
    %402 = vector.broadcast %337 : f32 to vector<1x128xf32>
    %403 = vector.broadcast %cst_114 : f32 to vector<1x128xf32>
    %404 = arith.select %401, %402, %403 : vector<1x128xi1>, vector<1x128xf32>
    %405 = arith.addf %399, %404 : vector<1x128xf32>
    %c11_i32 = arith.constant 11 : i32
    %406 = vector.broadcast %c11_i32 : i32 to vector<1x128xi32>
    %407 = arith.cmpi eq, %338, %406 : vector<1x128xi32>
    %cst_115 = arith.constant 0.000000e+00 : f32
    %408 = vector.broadcast %264 : f32 to vector<1x128xf32>
    %409 = vector.broadcast %cst_115 : f32 to vector<1x128xf32>
    %410 = arith.select %407, %408, %409 : vector<1x128xi1>, vector<1x128xf32>
    %411 = arith.addf %405, %410 : vector<1x128xf32>
    %c12_i32 = arith.constant 12 : i32
    %412 = vector.broadcast %c12_i32 : i32 to vector<1x128xi32>
    %413 = arith.cmpi eq, %338, %412 : vector<1x128xi32>
    %cst_116 = arith.constant 0.000000e+00 : f32
    %414 = vector.broadcast %333 : f32 to vector<1x128xf32>
    %415 = vector.broadcast %cst_116 : f32 to vector<1x128xf32>
    %416 = arith.select %413, %414, %415 : vector<1x128xi1>, vector<1x128xf32>
    %417 = arith.addf %411, %416 : vector<1x128xf32>
    %c13_i32 = arith.constant 13 : i32
    %418 = vector.broadcast %c13_i32 : i32 to vector<1x128xi32>
    %419 = arith.cmpi eq, %338, %418 : vector<1x128xi32>
    %cst_117 = arith.constant 0.000000e+00 : f32
    %420 = vector.broadcast %40 : f32 to vector<1x128xf32>
    %421 = vector.broadcast %cst_117 : f32 to vector<1x128xf32>
    %422 = arith.select %419, %420, %421 : vector<1x128xi1>, vector<1x128xf32>
    %423 = arith.addf %417, %422 : vector<1x128xf32>
    %c14_i32 = arith.constant 14 : i32
    %424 = vector.broadcast %c14_i32 : i32 to vector<1x128xi32>
    %425 = arith.cmpi eq, %338, %424 : vector<1x128xi32>
    %cst_118 = arith.constant 0.000000e+00 : f32
    %426 = vector.broadcast %44 : f32 to vector<1x128xf32>
    %427 = vector.broadcast %cst_118 : f32 to vector<1x128xf32>
    %428 = arith.select %425, %426, %427 : vector<1x128xi1>, vector<1x128xf32>
    %429 = arith.addf %423, %428 : vector<1x128xf32>
    %c15_i32 = arith.constant 15 : i32
    %430 = vector.broadcast %c15_i32 : i32 to vector<1x128xi32>
    %431 = arith.cmpi eq, %338, %430 : vector<1x128xi32>
    %cst_119 = arith.constant 0.000000e+00 : f32
    %432 = vector.broadcast %95 : f32 to vector<1x128xf32>
    %433 = vector.broadcast %cst_119 : f32 to vector<1x128xf32>
    %434 = arith.select %431, %432, %433 : vector<1x128xi1>, vector<1x128xf32>
    %435 = arith.addf %429, %434 : vector<1x128xf32>
    %c0_120 = arith.constant 0 : index
    %c0_121 = arith.constant 0 : index
    %436 = vector.load %arg13[%c0_120, %c0_121] : memref<1x128xf32, #tpu.memory_space<vmem>>, vector<1x128xf32>
    %437 = arith.addf %436, %435 : vector<1x128xf32>
    %c0_122 = arith.constant 0 : index
    %c0_123 = arith.constant 0 : index
    %438 = vector.load %arg13[%c0_122, %c0_123] : memref<1x128xf32, #tpu.memory_space<vmem>>, vector<1x128xf32>
    tpu.vector_store %arg13[%c0_122, %c0_123], %437 {strides = array<i32>} : memref<1x128xf32, #tpu.memory_space<vmem>>, vector<1x128xf32>,
    return
  }
  func.func @transform_0(%arg0: i32) -> (i32, i32, i32) {
    %c0_i32 = arith.constant 0 : i32
    %c0_i32_0 = arith.constant 0 : i32
    %c0_i32_1 = arith.constant 0 : i32
    return %arg0, %c0_i32, %c0_i32_0 : i32, i32, i32
  }
  func.func @transform_1(%arg0: i32) -> (i32, i32, i32) {
    %c0_i32 = arith.constant 0 : i32
    %c0_i32_0 = arith.constant 0 : i32
    %c0_i32_1 = arith.constant 0 : i32
    return %arg0, %c0_i32, %c0_i32_0 : i32, i32, i32
  }
  func.func @transform_2(%arg0: i32) -> (i32, i32, i32) {
    %c0_i32 = arith.constant 0 : i32
    %c0_i32_0 = arith.constant 0 : i32
    %c0_i32_1 = arith.constant 0 : i32
    return %arg0, %c0_i32, %c0_i32_0 : i32, i32, i32
  }
  func.func @transform_3(%arg0: i32) -> (i32, i32, i32) {
    %c0_i32 = arith.constant 0 : i32
    %c0_i32_0 = arith.constant 0 : i32
    %c0_i32_1 = arith.constant 0 : i32
    return %arg0, %c0_i32, %c0_i32_0 : i32, i32, i32
  }
  func.func @transform_4(%arg0: i32) -> (i32, i32, i32) {
    %c0_i32 = arith.constant 0 : i32
    %c0_i32_0 = arith.constant 0 : i32
    %c0_i32_1 = arith.constant 0 : i32
    return %arg0, %c0_i32, %c0_i32_0 : i32, i32, i32
  }
  func.func @transform_5(%arg0: i32) -> (i32, i32, i32) {
    %c0_i32 = arith.constant 0 : i32
    %c0_i32_0 = arith.constant 0 : i32
    %c0_i32_1 = arith.constant 0 : i32
    return %arg0, %c0_i32, %c0_i32_0 : i32, i32, i32
  }
  func.func @transform_6(%arg0: i32) -> (i32, i32, i32) {
    %c0_i32 = arith.constant 0 : i32
    %c0_i32_0 = arith.constant 0 : i32
    %c0_i32_1 = arith.constant 0 : i32
    return %arg0, %c0_i32, %c0_i32_0 : i32, i32, i32
  }
  func.func @transform_7(%arg0: i32) -> (i32, i32, i32) {
    %c0_i32 = arith.constant 0 : i32
    %c0_i32_0 = arith.constant 0 : i32
    %c0_i32_1 = arith.constant 0 : i32
    return %arg0, %c0_i32, %c0_i32_0 : i32, i32, i32
  }
  func.func @transform_8(%arg0: i32) -> (i32, i32, i32) {
    %c0_i32 = arith.constant 0 : i32
    %c0_i32_0 = arith.constant 0 : i32
    %c0_i32_1 = arith.constant 0 : i32
    return %arg0, %c0_i32, %c0_i32_0 : i32, i32, i32
  }
  func.func @transform_9(%arg0: i32) -> (i32, i32, i32) {
    %c0_i32 = arith.constant 0 : i32
    %c0_i32_0 = arith.constant 0 : i32
    %c0_i32_1 = arith.constant 0 : i32
    return %arg0, %c0_i32, %c0_i32_0 : i32, i32, i32
  }
  func.func @transform_10(%arg0: i32) -> (i32, i32, i32) {
    %c0_i32 = arith.constant 0 : i32
    %c0_i32_0 = arith.constant 0 : i32
    %c0_i32_1 = arith.constant 0 : i32
    return %arg0, %c0_i32, %c0_i32_0 : i32, i32, i32
  }
  func.func @transform_11(%arg0: i32) -> (i32, i32, i32) {
    %c0_i32 = arith.constant 0 : i32
    %c0_i32_0 = arith.constant 0 : i32
    %c0_i32_1 = arith.constant 0 : i32
    return %arg0, %c0_i32, %c0_i32_0 : i32, i32, i32
  }
  func.func @transform_12(%arg0: i32) -> (i32, i32) {
    %c0_i32 = arith.constant 0 : i32
    %c0_i32_0 = arith.constant 0 : i32
    %c0_i32_1 = arith.constant 0 : i32
    return %c0_i32, %c0_i32_0 : i32, i32
  }
}

</mosaic_0001>

<bundles_post_ra>
// kernel: _fused_losses.1
= control target key start
LH: loop header
LB: loop body
LE: loop exit
PB: predicated region body
PF: predicated region fallthrough
CT: control target
= control target key end

     0   :  { %s1375_s21 = smov 0   ;;  %s1659_s0 = inlined_call_operand.vmem [shape: f32[2,8,128], index: 0, kind: input, shape index: {}]   ;;  %s1660_s1 = inlined_call_operand.vmem [shape: f32[2,8,128], index: 1, kind: input, shape index: {}]   ;;  %s1661_s2 = inlined_call_operand.vmem [shape: f32[2,8,1], index: 2, kind: input, shape index: {}]   ;;  %s1662_s3 = inlined_call_operand.vmem [shape: f32[2,8,128], index: 3, kind: input, shape index: {}]   ;;  %s1663_s4 = inlined_call_operand.vmem [shape: f32[2,8,128], index: 4, kind: input, shape index: {}]   ;;  %s1664_s5 = inlined_call_operand.vmem [shape: f32[2,8,128], index: 5, kind: input, shape index: {}]   ;;  %s1665_s6 = inlined_call_operand.vmem [shape: f32[2,8,128], index: 6, kind: input, shape index: {}]   ;;  %s1666_s7 = inlined_call_operand.vmem [shape: f32[2,8,4], index: 7, kind: input, shape index: {}]   ;;  %s1667_s8 = inlined_call_operand.vmem [shape: f32[2,8,4], index: 8, kind: input, shape index: {}]   ;;  %s1668_s9 = inlined_call_operand.vmem [shape: f32[2,8,4], index: 9, kind: input, shape index: {}]   ;;  %s1669_s10 = inlined_call_operand.vmem [shape: f32[2,8,4], index: 10, kind: input, shape index: {}]   ;;  %s1670_s11 = inlined_call_operand.vmem [shape: f32[2,8,1], index: 11, kind: input, shape index: {}]   ;;  %s1671_s12 = inlined_call_operand.vmem [shape: f32[1,128], index: 12, kind: output, shape index: {}]  }
   0x1   :  { %1674 = sst [smem:[#allocation3_spill]] %s1659_s0 }
   0x2   :  { %1675 = sst [smem:[#allocation4_spill]] %s1664_s5 }
   0x3   :  { %1676 = sst [smem:[#allocation5_spill]] %s1671_s12 }
   0x4 LB: > { %1677 = sst [smem:[#allocation2_spill]] %s1303_s21  ;;  %s1201_s22 = sadd.s32 4294967295, %s1303_s21   ;;  %s1303_s21 = sphi %s1375_s21, %s22_s21  }
   0x5   : > { %p1204_p0 = scmp.ge.s32.totalorder %s1303_s21, 1  ;;  %p455_p1 = scmp.lt.s32.totalorder %s1303_s21, 3 }
   0x7   : > { %p456_p2 = pnand %p1204_p0, %p455_p1 }
   0x8   : > { %p535_p3 = scmp.lt.s32.totalorder (!%p456_p2), %s1201_s22, 1  ;;  %s1678_s0 = sld [smem:[#allocation3_spill]] (!%p456_p2) }
   0x9   : > { %459 = sbr.rel (%p456_p2) target bundleno = 635 (0x27b), region = 68  ;;  %s1679_s5 = sld [smem:[#allocation4_spill]] (!%p456_p2) }
   0xa   : > { %p1217_p4 = scmp.ne.s32.totalorder (!%p456_p2), %s1201_s22, 0 }
  0x10   : > { %s536_s23 = scalar_select %p535_p3, %s1201_s22, 1 }
  0x11   : > { %586 = sbr.rel (%p1217_p4) target bundleno = 24 (0x18), region = 72  ;;  %v1305_v0 = vmov (!%p1217_p4), 0.0   ;;  %s1680_s29 = sld [smem:[#allocation5_spill]] (!%p1217_p4) }
  0x12   : > { %s1383_s24 = sshll.u32 %s536_s23, 3 }
  0x13   : > { %s538_s27 = scalar_lea.vmem %s1678_s0, %s1383_s24  ;;  %s558_s0 = scalar_lea.vmem %s1679_s5, %s1383_s24 }
  0x14   : > { %s562_s28 = scalar_lea.vmem %s1665_s6, %s1383_s24  ;;  %s566_s13 = scalar_lea.vmem %s1666_s7, %s1383_s24 }
  0x15   : > { %s570_s16 = scalar_lea.vmem %s1667_s8, %s1383_s24  ;;  %s574_s19 = scalar_lea.vmem %s1668_s9, %s1383_s24 }
  0x16   : > { %s578_s25 = scalar_lea.vmem %s1669_s10, %s1383_s24  ;;  %s582_s12 = scalar_lea.vmem %s1670_s11, %s1383_s24 }
  0x17   : > { %587 = vst [vmem:[%s1680_s29] sm:$0x1] (!%p1217_p4), %v1305_v0 }
  0x18 PF: > { %v589_v1 = vld [vmem:[%s538_s27] sm:$0xff]  ;;  %s1306_s5 = smov 126   ;;  %v1307_v11 = vmov 0.0   ;;  %vm798_vm1 = vcmask 31744   ;;  %v652_v13 = vlaneseq  ;;  %s1681_s27 = scalar_lea.vmem %s1660_s1, %s1383_s24  ;;  %v1308_v22 = vmov 0  }
  0x19   : > { %v1436_v2 = vld [vmem:[%s566_s13] sm:$0xff]  ;;  %592 = vmax.xlane.f32.xlu0 %v589_v1  ;;  %1272 = vset.pattern.permute.xlu1 %v1308_v22  ;;  %s1309_s23 = smov 127   ;;  %s1682_s14 = scalar_lea.vmem %s1662_s3, %s1383_s24  ;;  %vm607_vm5 = vcmask 7168  }
  0x1a   : > { %v839_v3 = vmul.f32 0.5, %v1436_v2  ;;  %v1439_v4 = vld [vmem:[%s574_s19] sm:$0xff]  ;;  %v1459_v16 = vand.u32 127, %v652_v13  ;;  %1271 = vset.pattern.permute.xlu0 %v1308_v22  ;;  %s1684_s21 = scalar_lea.vmem %s1663_s4, %s1383_s24 }
  0x1b   : > { %v1441_v5 = vld [vmem:[%s558_s0] sm:$0xff]  ;;  %v846_v6 = vmul.f32 0.5, %v1439_v4 }
  0x1c   : > { %841 = vrot.lane.b32.xlu1 %v839_v3, %s1306_s5  ;;  %v1444_v7 = vld [vmem:[%s578_s25] sm:$0xff]  ;;  %vm654_vm2 = vcmp.lt.s32.totalorder %v1459_v16, 4  ;;  %vm658_vm3 = vcmp.eq.s32.totalorder %v1459_v16, 4  ;;  %s1683_s25 = scalar_lea.vmem %s1661_s2, %s1383_s24  ;;  %vm719_vm8 = vcmp.lt.s32.totalorder %v1459_v16, 8 }
  0x1d   : > { %679 = vmax.xlane.f32.xlu0 %v1441_v5  ;;  %v909_v8 = vmul.f32 0.5, %v1444_v7  ;;  %v1448_v9 = vld [vmem:[%s570_s16] sm:$0xff]  ;;  %vm795_vm0 = vcmp.ne.f32.partialorder %v1444_v7, 0.0  ;;  %v655_v19 = vsel %vm654_vm2, %v589_v1, -1e+09  ;;  %v659_v21 = vsel %vm658_vm3, %v589_v1, 0.0 }
  0x1e   : > { %v902_v10 = vmul.f32 0.5, %v1448_v9  ;;  %v1223_v12 = vsel %vm795_vm0, 1.0, %v1307_v11  ;;  %v590_v15 = vld [vmem:[%s1681_s27] sm:$0xff]  ;;  %vm979_vm2 = vcmp.eq.s32.totalorder %v1459_v16, 1 }
  0x1f   : > { %v799_v14 = vsel %vm798_vm1, %v1223_v12, -inf  ;;  %v602_v17 = vmul.f32 %v590_v15, %v589_v1  ;;  %v678_v18 = vld [vmem:[%s562_s28] sm:$0xff] }
  0x20   : > { %848 = vrot.lane.b32.xlu1 %v846_v6, %s1306_s5  ;;  %v689_v20 = vmul.f32 %v678_v18, %v1441_v5  ;;  %v717_v55 = vld [vmem:[%s1682_s14] sm:$0xff] }
  0x21   : > { %v1221_v56 = vmul.f32 -1.442695, %v717_v55  ;;  %v1532_v62 = vld [vmem:[%s582_s12] sm:$0xff] }
  0x22   : > { %v1544_v12 = vld [vmem:[%s1683_s25] sm:$0xff] }
  0x23   : > { %v618_v18 = vsel %vm607_vm5, %v1544_v12, 0.0 }
  0x24   : > { %911 = vrot.lane.b32.xlu1 %v909_v8, %s1306_s5 }
  0x33   : > { %904 = vrot.lane.b32.xlu0 %v902_v10, %s1306_s5 }
  0x48   : > { %800 = vmax.xlane.f32.xlu1 %v799_v14 }
  0x4c   : > { %603 = vadd.xlane.f32.xlu1 %v602_v17 }
  0x50   : > { %656 = vmax.xlane.f32.xlu1 %v655_v19 }
  0x52   : > { %690 = vadd.xlane.f32.xlu0 %v689_v20 }
  0x54   : > { %660 = vadd.xlane.f32.xlu1 %v659_v21  ;;  %v718_v21 = vld [vmem:[%s1684_s21] sm:$0xff]  ;;  %s1687_s21 = sld [smem:[#allocation5_spill]] }
  0x55   : > { %vm728_vm9 = vcmp.eq.f32.partialorder %v718_v21, 0.0  ;;  %vm730_vm10 = vcmp.gt.f32.partialorder %v718_v21, 0.0  ;;  %vm731_vm11 = vcmp.lt.f32.partialorder %v718_v21, 1.0  ;;  %vm726_vm15 = vcmp.eq.f32.partialorder %v718_v21, 1.0 }
  0x56   : > { %vm729_vm12 = vmand %vm719_vm8, %vm728_vm9  ;;  %vm1006_vm9 = vcmp.eq.s32.totalorder %v1459_v16, 8 }
  0x57   : > { %vm732_vm13 = vmand %vm730_vm10, %vm731_vm11  ;;  %vm1014_vm10 = vcmp.eq.s32.totalorder %v1459_v16, 10  ;;  %vm1018_vm11 = vcmp.eq.s32.totalorder %v1459_v16, 11 }
  0x58   : > { %vm733_vm14 = vmand %vm719_vm8, %vm732_vm13  ;;  %vm1026_vm13 = vcmp.eq.s32.totalorder %v1459_v16, 13 }
  0x59   : > { %vm1578_vm0 = vmand %vm719_vm8, %vm726_vm15  ;;  %vm1002_vm8 = vcmp.eq.s32.totalorder %v1459_v16, 7  ;;  %vm1034_vm15 = vcmp.eq.s32.totalorder %v1459_v16, 15 }
  0x8e   : > { %v842_v23 = vpop.permute.xlu1 %841 }
  0x8f   : > { %v844_v24 = vsub.f32 %v1436_v2, %v842_v23  ;;  %v845_v25 = vadd.f32 %v842_v23, %v1436_v2 }
  0x91   : > { %v1473_v26 = vsub.f32 %v845_v25, %v844_v24 }
  0x92   : > { %v849_v27 = vpop.permute.xlu1 %848 }
  0x93   : > { %v851_v28 = vsub.f32 %v1439_v4, %v849_v27  ;;  %v852_v29 = vadd.f32 %v849_v27, %v1439_v4  ;;  %855 = vrot.lane.b32.xlu1 %v1473_v26, %s1309_s23  ;;  %v748_v27 = vsub.f32 1.0, %v718_v21 }
  0x95   : > { %v865_v30 = vmin.f32 %v845_v25, %v852_v29  ;;  %v866_v31 = vmax.f32 %v844_v24, %v851_v28  ;;  %v1479_v32 = vsub.f32 %v852_v29, %v851_v28  ;;  %v878_v57 = vmax.f32 %v845_v25, %v852_v29 }
  0x96   : > { %v912_v39 = vpop.permute.xlu1 %911  ;;  %v879_v58 = vmin.f32 %v844_v24, %v851_v28 }
  0x97   : > { %861 = vrot.lane.b32.xlu0 %v1479_v32, %s1309_s23  ;;  %v1483_v33 = vsub.f32 %v865_v30, %v866_v31  ;;  %v914_v40 = vsub.f32 %v1444_v7, %v912_v39  ;;  %v915_v41 = vadd.f32 %v912_v39, %v1444_v7 }
  0x98   : > { %v1521_v59 = vsub.f32 %v878_v57, %v879_v58  ;;  %v642_v57 = vsel %vm607_vm5, %v1532_v62, 0.0 }
  0x99   : > { %v868_v34 = vmax.f32 %v1483_v33, 0.0  ;;  %v1502_v48 = vsub.f32 %v915_v41, %v914_v40 }
  0x9b   : > { %870 = vrot.lane.b32.xlu0 %v868_v34, %s1309_s23 }
  0xa6   : > { %v1489_v35 = vpop.xlane.xlu0 %592 }
  0xa7   : > { %v594_v36 = vsub.f32 %v589_v1, %v1489_v35 }
  0xa9   : > { %v595_v37 = vmul.f32 1.442695, %v594_v36 }
  0xaa   : > { %v1492_v38 = vpop.xlane.xlu0 %679 }
  0xab   : > { %1273 = vpow2.f32 %v595_v37  ;;  %v681_v61 = vsub.f32 %v1441_v5, %v1492_v38 }
  0xac   : > { %1275 = vpow2.f32 %v1221_v56 }
  0xad   : > { %v682_v0 = vmul.f32 1.442695, %v681_v61 }
  0xae   : > { %v905_v42 = vpop.permute.xlu0 %904 }
  0xaf   : > { %v907_v43 = vsub.f32 %v1448_v9, %v905_v42  ;;  %v908_v44 = vadd.f32 %v905_v42, %v1448_v9 }
  0xb1   : > { %v928_v45 = vmin.f32 %v908_v44, %v915_v41  ;;  %v929_v46 = vmax.f32 %v907_v43, %v914_v40  ;;  %v1498_v47 = vsub.f32 %v908_v44, %v907_v43  ;;  %v941_v52 = vmax.f32 %v908_v44, %v915_v41 }
  0xb2   : > { %v942_v53 = vmin.f32 %v907_v43, %v914_v40 }
  0xb3   : > { %918 = vrot.lane.b32.xlu1 %v1498_v47, %s1309_s23  ;;  %v1504_v49 = vsub.f32 %v928_v45, %v929_v46 }
  0xb4   : > { %v1512_v54 = vsub.f32 %v941_v52, %v942_v53 }
  0xb5   : > { %v1274_v50 = vpop.eup %1273  ;;  %v931_v51 = vmax.f32 %v1504_v49, 0.0 }
  0xb6   : > { %v1276_v60 = vpop.eup %1275 }
  0xb7   : > { %924 = vrot.lane.b32.xlu1 %v1502_v48, %s1309_s23  ;;  %v723_v63 = vadd.f32 1.0, %v1276_v60 }
  0xb9   : > { %1277 = vrcp.f32 %v723_v63 }
  0xba   : > { %597 = vadd.xlane.f32.xlu0 %v1274_v50  ;;  %1279 = vpow2.f32 %v682_v0 }
  0xbb   : > { %933 = vrot.lane.b32.xlu1 %v931_v51, %s1309_s23 }
  0xbf   : > { %945 = vrot.lane.b32.xlu1 %v1512_v54, %s1309_s23 }
  0xc3   : > { %v1278_v3 = vpop.eup %1277 }
  0xc4   : > { %v736_v6 = vsub.f32 1.0, %v1278_v3  ;;  %v1280_v8 = vpop.eup %1279  ;;  %v744_v36 = vmul.f32 %v1278_v3, %v1278_v3 }
  0xc6   : > { %1281 = vlog2.f32 %v736_v6  ;;  %v740_v52 = vmul.f32 %v736_v6, %v736_v6 }
  0xc7   : > { %1283 = vlog2.f32 %v1278_v3 }
  0xd0   : > { %882 = vrot.lane.b32.xlu0 %v1521_v59, %s1309_s23  ;;  %v1282_v15 = vpop.eup %1281 }
  0xd1   : > { %v1284_v19 = vpop.eup %1283  ;;  %v738_v24 = vmul.f32 0.6931472, %v1282_v15 }
  0xd2   : > { %v735_v25 = vmul.f32 0.6931472, %v1284_v19 }
  0xd3   : > { %v743_v31 = vmul.f32 0.5, %v738_v24  ;;  %v749_v39 = vmul.f32 %v748_v27, %v738_v24 }
  0xd4   : > { %807 = vperm.xlu0 %1271, %v1532_v62   ;;  %v747_v37 = vmul.f32 %v735_v25, %v718_v21  ;;  %v739_v50 = vmul.f32 0.5, %v735_v25 }
  0xd5   : > { %v801_v1 = vpop.xlane.xlu1 %800  ;;  %v745_v41 = vmul.f32 %v744_v36, %v743_v31 }
  0xd6   : > { %v1552_v20 = vmul.f32 %v801_v1, %v1532_v62  ;;  %v750_v42 = vadd.f32 %v749_v39, %v747_v37  ;;  %v1574_v53 = vmul.f32 %v740_v52, %v739_v50 }
  0xd7   : > { %v746_v44 = vsel %vm729_vm12, %v745_v41, 0.0  ;;  %vm1022_vm12 = vcmp.eq.s32.totalorder %v1459_v16, 12 }
  0xd8   : > { %v751_v45 = vsub.f32 0.0, %v750_v42  ;;  %v742_v56 = vsel %vm1578_vm0, %v1574_v53, 0.0 }
  0xd9   : > { %v1535_v10 = vpop.xlane.xlu1 %603 }
  0xda   : > { %vm628_vm4 = vcmp.ge.f32.partialorder %v1535_v10, %v1489_v35  ;;  %v752_v46 = vsel %vm733_vm14, %v751_v45, 0.0  ;;  %vm1030_vm14 = vcmp.eq.s32.totalorder %v1459_v16, 14 }
  0xdb   : > { %v1218_v14 = vsel %vm628_vm4, 1.0, %v1307_v11  ;;  %vm983_vm4 = vcmp.eq.s32.totalorder %v1459_v16, 2 }
  0xdc   : > { %v631_v22 = vmul.f32 %v1218_v14, %v1532_v62 }
  0xdd   : > { %v657_v5 = vpop.xlane.xlu1 %656 }
  0xde   : > { %v632_v28 = vsel %vm607_vm5, %v631_v22, 0.0 }
  0xdf   : > { %v1547_v17 = vpop.xlane.xlu0 %690 }
  0xe0   : > { %vm703_vm7 = vcmp.ge.f32.partialorder %v1547_v17, %v1492_v38 }
  0xe1   : > { %v661_v13 = vpop.xlane.xlu1 %660  ;;  %v1220_v29 = vsel %vm703_vm7, 1.0, %v1307_v11  ;;  %vm998_vm7 = vcmp.eq.s32.totalorder %v1459_v16, 6 }
  0xe2   : > { %vm662_vm6 = vcmp.ge.f32.partialorder %v657_v5, %v661_v13  ;;  %v706_v40 = vmul.f32 %v1220_v29, %v1532_v62 }
  0xe3   : > { %684 = vadd.xlane.f32.xlu1 %v1280_v8  ;;  %v1219_v23 = vsel %vm662_vm6, 1.0, %v1307_v11  ;;  %vm994_vm6 = vcmp.eq.s32.totalorder %v1459_v16, 5 }
  0xe4   : > { %v665_v30 = vsel %vm607_vm5, %v1219_v23, 0.0  ;;  %v707_v43 = vsel %vm607_vm5, %v706_v40, 0.0 }
  0xf3   : > { %619 = vadd.xlane.f32.xlu0 %v618_v18 }
  0xf4   : > { %825 = vperm.xlu1 %1272, %v1552_v20  }
  0xf7   : > { %633 = vadd.xlane.f32.xlu0 %v632_v28 }
  0xfb   : > { %666 = vadd.xlane.f32.xlu0 %v665_v30 }
  0xff   : > { %708 = vadd.xlane.f32.xlu0 %v707_v43 }
 0x103   : > { %762 = vadd.xlane.f32.xlu0 %v746_v44 }
 0x105   : > { %v856_v58 = vpop.permute.xlu1 %855 }
 0x106   : > { %v858_v28 = vmul.f32 %v856_v58, %v1473_v26 }
 0x107   : > { %782 = vadd.xlane.f32.xlu0 %v752_v46 }
 0x109   : > { %v862_v13 = vpop.permute.xlu0 %861 }
 0x10a   : > { %v864_v24 = vmul.f32 %v862_v13, %v1479_v32 }
 0x10c   : > { %v874_v36 = vadd.f32 %v864_v24, %v858_v28 }
 0x10d   : > { %v871_v15 = vpop.permute.xlu0 %870 }
 0x10e   : > { %v873_v29 = vmul.f32 %v871_v15, %v868_v34 }
 0x118   : > { %643 = vadd.xlane.f32.xlu1 %v642_v57 }
 0x125   : > { %v919_v60 = vpop.permute.xlu1 %918 }
 0x126   : > { %v921_v3 = vmul.f32 %v919_v60, %v1498_v47  ;;  %v821_v47 = vsub.f32 %v1448_v9, %v1444_v7  ;;  %v875_v9 = vsub.f32 %v874_v36, %v873_v29 }
 0x129   : > { %v925_v61 = vpop.permute.xlu1 %924 }
 0x12a   : > { %v927_v0 = vmul.f32 %v925_v61, %v1502_v48 }
 0x12c   : > { %v937_v8 = vadd.f32 %v927_v0, %v921_v3 }
 0x12d   : > { %v934_v63 = vpop.permute.xlu1 %933 }
 0x12e   : > { %v936_v6 = vmul.f32 %v934_v63, %v931_v51 }
 0x130   : > { %v938_v14 = vsub.f32 %v937_v8, %v936_v6 }
 0x131   : > { %v946_v1 = vpop.permute.xlu1 %945 }
 0x132   : > { %v948_v5 = vmul.f32 %v946_v1, %v1512_v54  ;;  %v822_v54 = vand.u32 2147483647, %v821_v47  ;;  %v965_v1 = vsel %vm607_vm5, %v1552_v20, 0.0 }
 0x134   : > { %1285 = vrcp.f32 %v948_v5  ;;  %v949_v21 = vsub.f32 %v948_v5, %v938_v14 }
 0x135   : > { %1287 = vrcp.f32 %v938_v14 }
 0x13e   : > { %v1286_v19 = vpop.eup %1285 }
 0x13f   : > { %v1288_v22 = vpop.eup %1287  ;;  %v951_v48 = vmul.f32 %v1286_v19, %v949_v21 }
 0x140   : > { %v940_v23 = vmul.f32 %v1288_v22, %v936_v6 }
 0x142   : > { %v952_v49 = vsub.f32 %v940_v23, %v951_v48 }
 0x144   : > { %v953_v30 = vsub.f32 1.0, %v952_v49 }
 0x146   : > { %v954_v32 = vmul.f32 %v953_v30, %v1552_v20 }
 0x147   : > { %v598_v18 = vpop.xlane.xlu0 %597 }
 0x148   : > { %1289 = vlog2.f32 %v598_v18  ;;  %v955_v33 = vsel %vm607_vm5, %v954_v32, 0.0 }
 0x14b   : > { %v883_v25 = vpop.permute.xlu0 %882 }
 0x14c   : > { %v885_v37 = vmul.f32 %v883_v25, %v1521_v59 }
 0x14e   : > { %v886_v50 = vsub.f32 %v885_v37, %v875_v9 }
 0x152   : > { %v1290_v27 = vpop.eup %1289 }
 0x153   : > { %v600_v7 = vmul.f32 0.6931472, %v1290_v27  ;;  %v808_v61 = vpop.permute.xlu0 %807 }
 0x155   : > { %v601_v41 = vadd.f32 %v600_v7, %v1489_v35  ;;  %v803_v35 = vsub.f32 %v1436_v2, %v1439_v4 }
 0x157   : > { %v605_v59 = vsub.f32 %v601_v41, %v1535_v10  ;;  %v804_v60 = vand.u32 2147483647, %v803_v35 }
 0x159   : > { %v606_v45 = vmul.f32 %v605_v59, %v1544_v12  ;;  %v810_v12 = vmul.f32 %v808_v61, %v804_v60 }
 0x15b   : > { %v608_v58 = vsel %vm607_vm5, %v606_v45, 0.0  ;;  %v811_v4 = vsel %vm798_vm1, %v810_v12, 0.0 }
 0x170   : > { %v685_v51 = vpop.xlane.xlu1 %684 }
 0x171   : > { %1291 = vlog2.f32 %v685_v51 }
 0x172   : > { %1293 = vrcp.f32 %v885_v37 }
 0x173   : > { %1295 = vrcp.f32 %v875_v9 }
 0x174   : > { %v826_v31 = vpop.permute.xlu1 %825 }
 0x175   : > { %v828_v39 = vmul.f32 %v826_v31, %v822_v54 }
 0x177   : > { %v829_v40 = vsel %vm798_vm1, %v828_v39, 0.0  ;;  %vm975_vm1 = vcmp.eq.s32.totalorder %v1459_v16, 0 }
 0x178   : > { %830 = vadd.xlane.f32.xlu0 %v829_v40 }
 0x17b   : > { %v1292_v26 = vpop.eup %1291 }
 0x17c   : > { %v687_v34 = vmul.f32 0.6931472, %v1292_v26  ;;  %956 = vadd.xlane.f32.xlu0 %v955_v33  ;;  %v1294_v46 = vpop.eup %1293 }
 0x17d   : > { %v1296_v52 = vpop.eup %1295  ;;  %v888_v57 = vmul.f32 %v1294_v46, %v886_v50 }
 0x17e   : > { %v688_v42 = vadd.f32 %v687_v34, %v1492_v38  ;;  %v877_v38 = vmul.f32 %v1296_v52, %v873_v29 }
 0x180   : > { %v692_v43 = vsub.f32 %v688_v42, %v1547_v17  ;;  %v889_v10 = vsub.f32 %v877_v38, %v888_v57  ;;  %v1222_v17 = vsel %vm1578_vm0, 1.0, %v1307_v11  ;;  %v620_v53 = vpop.xlane.xlu0 %619 }
 0x181   : > { %v621_v5 = vrot.slane %v620_v53, 4 }
 0x182   : > { %v693_v44 = vsel %vm607_vm5, %v692_v43, 0.0  ;;  %v890_v2 = vsub.f32 1.0, %v889_v10 }
 0x183   : > { %694 = vadd.xlane.f32.xlu1 %v693_v44  ;;  %v622_v19 = vadd.f32 %v621_v5, %v620_v53 }
 0x184   : > { %v891_v63 = vmul.f32 %v890_v2, %v1532_v62 }
 0x185   : > { %v623_v24 = vrot.slane %v622_v19, 2 }
 0x186   : > { %v892_v0 = vsel %vm607_vm5, %v891_v63, 0.0  ;;  %vm987_vm5 = vcmp.eq.s32.totalorder %v1459_v16, 3 }
 0x187   : > { %609 = vadd.xlane.f32.xlu1 %v608_v58  ;;  %v624_v32 = vadd.f32 %v623_v24, %v622_v19 }
 0x189   : > { %v625_v58 = vrot.slane %v624_v32, 1 }
 0x18b   : > { %753 = vadd.xlane.f32.xlu1 %v742_v56  ;;  %v634_v56 = vpop.xlane.xlu0 %633 }
 0x18c   : > { %v635_v11 = vrot.slane %v634_v56, 4 }
 0x18e   : > { %v636_v14 = vadd.f32 %v635_v11, %v634_v56  ;;  %v626_v11 = vadd.f32 %v625_v58, %v624_v32 }
 0x18f   : > { %773 = vadd.xlane.f32.xlu1 %v1222_v17  ;;  %v667_v3 = vpop.xlane.xlu0 %666 }
 0x190   : > { %v668_v15 = vrot.slane %v667_v3, 4  ;;  %v637_v48 = vrot.slane %v636_v14, 2 }
 0x192   : > { %v669_v23 = vadd.f32 %v668_v15, %v667_v3  ;;  %v638_v36 = vadd.f32 %v637_v48, %v636_v14 }
 0x193   : > { %812 = vadd.xlane.f32.xlu1 %v811_v4  ;;  %v709_v6 = vpop.xlane.xlu0 %708 }
 0x194   : > { %v710_v62 = vrot.slane %v709_v6, 4  ;;  %v670_v29 = vrot.slane %v669_v23, 2  ;;  %v639_v42 = vrot.slane %v638_v36, 1 }
 0x196   : > { %v711_v20 = vadd.f32 %v710_v62, %v709_v6  ;;  %v671_v43 = vadd.f32 %v670_v29, %v669_v23  ;;  %v640_v17 = vadd.f32 %v639_v42, %v638_v36 }
 0x197   : > { %893 = vadd.xlane.f32.xlu1 %v892_v0  ;;  %v763_v55 = vpop.xlane.xlu0 %762 }
 0x198   : > { %v764_v49 = vrot.slane %v763_v55, 4  ;;  %v712_v30 = vrot.slane %v711_v20, 2  ;;  %v672_v4 = vrot.slane %v671_v43, 1 }
 0x19a   : > { %v765_v37 = vadd.f32 %v764_v49, %v763_v55  ;;  %v713_v44 = vadd.f32 %v712_v30, %v711_v20 }
 0x19b   : > { %966 = vadd.xlane.f32.xlu1 %v965_v1  ;;  %v783_v13 = vpop.xlane.xlu0 %782 }
 0x19c   : > { %v784_v27 = vrot.slane %v783_v13, 4  ;;  %v766_v45 = vrot.slane %v765_v37, 2  ;;  %v714_v63 = vrot.slane %v713_v44, 1 }
 0x19e   : > { %v785_v41 = vadd.f32 %v784_v27, %v783_v13  ;;  %v767_v56 = vadd.f32 %v766_v45, %v765_v37 }
 0x1a0   : > { %v786_v60 = vrot.slane %v785_v41, 2 }
 0x1a2   : > { %v787_v15 = vadd.f32 %v786_v60, %v785_v41 }
 0x1a4   : > { %v788_v27 = vrot.slane %v787_v15, 1 }
 0x1a5   : > { %v644_v8 = vpop.xlane.xlu1 %643 }
 0x1a6   : > { %v645_v18 = vrot.slane %v644_v8, 4 }
 0x1a8   : > { %v646_v47 = vadd.f32 %v645_v18, %v644_v8  ;;  %v673_v18 = vadd.f32 %v672_v4, %v671_v43 }
 0x1aa   : > { %v647_v31 = vrot.slane %v646_v47, 2 }
 0x1ac   : > { %v648_v59 = vadd.f32 %v647_v31, %v646_v47 }
 0x1ae   : > { %v649_v2 = vrot.slane %v648_v59, 1 }
 0x1b0   : > { %v650_v62 = vadd.f32 %v649_v2, %v648_v59 }
 0x205   : > { %v831_v51 = vpop.xlane.xlu0 %830 }
 0x206   : > { %v832_v7 = vrot.slane %v831_v51, 4 }
 0x208   : > { %v833_v35 = vadd.f32 %v832_v7, %v831_v51 }
 0x209   : > { %v957_v26 = vpop.xlane.xlu0 %956 }
 0x20a   : > { %v958_v52 = vrot.slane %v957_v26, 4  ;;  %v834_v3 = vrot.slane %v833_v35, 2 }
 0x20c   : > { %v959_v6 = vadd.f32 %v958_v52, %v957_v26  ;;  %v835_v51 = vadd.f32 %v834_v3, %v833_v35 }
 0x20e   : > { %v960_v23 = vrot.slane %v959_v6, 2 }
 0x210   : > { %v695_v21 = vpop.xlane.xlu1 %694  ;;  %v961_v36 = vadd.f32 %v960_v23, %v959_v6 }
 0x211   : > { %v696_v22 = vrot.slane %v695_v21, 4 }
 0x212   : > { %v962_v42 = vrot.slane %v961_v36, 1 }
 0x213   : > { %v697_v54 = vadd.f32 %v696_v22, %v695_v21  ;;  %v715_v21 = vadd.f32 %v714_v63, %v713_v44  ;;  %v768_v22 = vrot.slane %v767_v56, 1 }
 0x214   : > { %v610_v25 = vpop.xlane.xlu1 %609 }
 0x215   : > { %v611_v28 = vrot.slane %v610_v25, 4  ;;  %v698_v9 = vrot.slane %v697_v54, 2  ;;  %v769_v29 = vadd.f32 %v768_v22, %v767_v56 }
 0x217   : > { %v612_v39 = vadd.f32 %v611_v28, %v610_v25  ;;  %v699_v38 = vadd.f32 %v698_v9, %v697_v54 }
 0x218   : > { %v754_v40 = vpop.xlane.xlu1 %753 }
 0x219   : > { %v613_v33 = vrot.slane %v612_v39, 2  ;;  %v755_v34 = vrot.slane %v754_v40, 4  ;;  %v700_v8 = vrot.slane %v699_v38, 1 }
 0x21b   : > { %v756_v46 = vadd.f32 %v755_v34, %v754_v40  ;;  %v614_v50 = vadd.f32 %v613_v33, %v612_v39  ;;  %v701_v20 = vadd.f32 %v700_v8, %v699_v38  ;;  %v836_v39 = vrot.slane %v835_v51, 1 }
 0x21c   : > { %v774_v57 = vpop.xlane.xlu1 %773  ;;  %v789_v40 = vadd.f32 %v788_v27, %v787_v15 }
 0x21d   : > { %v757_v10 = vrot.slane %v756_v46, 2  ;;  %v775_v61 = vrot.slane %v774_v57, 4  ;;  %v615_v12 = vrot.slane %v614_v50, 1  ;;  %v837_v34 = vadd.f32 %v836_v39, %v835_v51  ;;  %v1038_v39 = vld [vmem:[%s1687_s21] sm:$0x1] }
 0x21f   : > { %v776_v0 = vadd.f32 %v775_v61, %v774_v57  ;;  %v616_v1 = vadd.f32 %v615_v12, %v614_v50  ;;  %v758_v53 = vadd.f32 %v757_v10, %v756_v46  ;;  %v963_v46 = vadd.f32 %v962_v42, %v961_v36 }
 0x220   : > { %v813_v55 = vpop.xlane.xlu1 %812 }
 0x221   : > { %v777_v5 = vrot.slane %v776_v0, 2  ;;  %v814_v13 = vrot.slane %v813_v55, 4  ;;  %1226 = vpush %v616_v1  ;;  %v759_v14 = vrot.slane %v758_v53, 1 }
 0x222   : > { %1228 = vpush %v626_v11 }
 0x223   : > { %v815_v19 = vadd.f32 %v814_v13, %v813_v55  ;;  %1230 = vpush %v640_v17  ;;  %v778_v48 = vadd.f32 %v777_v5, %v776_v0  ;;  %v760_v49 = vadd.f32 %v759_v14, %v758_v53 }
 0x224   : > { %1232 = vpush %v650_v62  ;;  %v894_v47 = vpop.xlane.xlu1 %893 }
 0x225   : > { %v816_v24 = vrot.slane %v815_v19, 2  ;;  %1234 = vpush %v673_v18  ;;  %v895_v54 = vrot.slane %v894_v47, 4  ;;  %v779_v25 = vrot.slane %v778_v48, 1 }
 0x226   : > { %1236 = vpush %v701_v20 }
 0x227   : > { %1238 = vpush %v715_v21  ;;  %v896_v28 = vadd.f32 %v895_v54, %v894_v47  ;;  %v780_v30 = vadd.f32 %v779_v25, %v778_v48  ;;  %v817_v31 = vadd.f32 %v816_v24, %v815_v19 }
 0x228   : > { %1240 = vpush %v760_v49  ;;  %v967_v37 = vpop.xlane.xlu1 %966 }
 0x229   : > { %v897_v7 = vrot.slane %v896_v28, 2  ;;  %1242 = vpush %v769_v29  ;;  %v968_v9 = vrot.slane %v967_v37, 4  ;;  %v818_v32 = vrot.slane %v817_v31, 1 }
 0x22a   : > { %1244 = vpush %v780_v30 }
 0x22b   : > { %v969_v41 = vadd.f32 %v968_v9, %v967_v37  ;;  %1246 = vpush %v789_v40  ;;  %v819_v26 = vadd.f32 %v818_v32, %v817_v31  ;;  %v898_v33 = vadd.f32 %v897_v7, %v896_v28 }
 0x22d   : > { %v970_v59 = vrot.slane %v969_v41, 2  ;;  %1248 = vpush %v819_v26  ;;  %v899_v43 = vrot.slane %v898_v33, 1 }
 0x22e   : > { %1250 = vpush %v837_v34 }
 0x22f   : > { %v971_v44 = vadd.f32 %v970_v59, %v969_v41  ;;  %v900_v45 = vadd.f32 %v899_v43, %v898_v33 }
 0x231   : > { %1252 = vpush %v900_v45  ;;  %v972_v50 = vrot.slane %v971_v44, 1 }
 0x232   : > { %1254 = vpush %v963_v46 }
 0x233   : > { %v973_v35 = vadd.f32 %v972_v50, %v971_v44 }
 0x235   : > { %1256 = vpush %v973_v35 }
 0x252   : > { %s1227_s24 = spop %1226 }
 0x253   : > { %v976_v52 = vstv %s1227_s24  ;;  %s1229_s30 = spop %1228 }
 0x254   : > { %v980_v57 = vstv %s1229_s30  ;;  %s1625_s29 = spop %1230  ;;  %v977_v58 = vsel %vm975_vm1, %v976_v52, 0.0 }
 0x255   : > { %v981_v38 = vsel %vm979_vm2, %v980_v57, 0.0  ;;  %s1627_s5 = spop %1232  ;;  %v1027_v51 = vstv %s1625_s29 }
 0x256   : > { %s1235_s0 = spop %1234  ;;  %v982_v60 = vadd.f32 %v981_v38, %v977_v58  ;;  %v1031_v25 = vstv %s1627_s5  ;;  %v1028_v28 = vsel %vm1026_vm13, %v1027_v51, 0.0 }
 0x257   : > { %s675_s22 = ssub.f32 %s1235_s0, %s1627_s5  ;;  %s1237_s27 = spop %1236  ;;  %v1032_v31 = vsel %vm1030_vm14, %v1031_v25, 0.0 }
 0x258   : > { %s1631_s15 = spop %1238  ;;  %v988_v61 = vstv %s1237_s27 }
 0x259   : > { %s676_s18 = sand.u32 2147483647, %s675_s22  ;;  %s1241_s23 = spop %1240  ;;  %v989_v4 = vsel %vm987_vm5, %v988_v61, 0.0  ;;  %v1035_v29 = vstv %s1631_s15 }
 0x25a   : > { %v984_v10 = vstv %s676_s18  ;;  %s1243_s28 = spop %1242  ;;  %v991_v2 = vstv %s1241_s23  ;;  %v1036_v37 = vsel %vm1034_vm15, %v1035_v29, 0.0 }
 0x25b   : > { %v985_v12 = vsel %vm983_vm4, %v984_v10, 0.0  ;;  %s1245_s13 = spop %1244  ;;  %v995_v0 = vstv %s1243_s28  ;;  %v992_v1 = vsel %vm658_vm3, %v991_v2, 0.0  ;;  %vm1010_vm3 = vcmp.eq.s32.totalorder %v1459_v16, 9 }
 0x25c   : > { %v986_v17 = vadd.f32 %v985_v12, %v982_v60  ;;  %s1247_s14 = spop %1246  ;;  %v999_v56 = vstv %s1245_s13  ;;  %v996_v3 = vsel %vm994_vm6, %v995_v0, 0.0 }
 0x25d   : > { %v1003_v55 = vstv %s1247_s14  ;;  %v1000_v11 = vsel %vm998_vm7, %v999_v56, 0.0 }
 0x25e   : > { %v990_v63 = vadd.f32 %v989_v4, %v986_v17  ;;  %s1249_s16 = spop %1248  ;;  %v1004_v13 = vsel %vm1002_vm8, %v1003_v55, 0.0 }
 0x25f   : > { %s1251_s17 = spop %1250  ;;  %v1007_v5 = vstv %s1249_s16 }
 0x260   : > { %v993_v53 = vadd.f32 %v992_v1, %v990_v63  ;;  %v1011_v15 = vstv %s1251_s17  ;;  %v1008_v62 = vsel %vm1006_vm9, %v1007_v5, 0.0 }
 0x261   : > { %v1012_v21 = vsel %vm1010_vm3, %v1011_v15, 0.0 }
 0x262   : > { %v997_v6 = vadd.f32 %v996_v3, %v993_v53  ;;  %s1253_s19 = spop %1252 }
 0x263   : > { %s1255_s20 = spop %1254  ;;  %v1019_v23 = vstv %s1253_s19 }
 0x264   : > { %v1001_v8 = vadd.f32 %v1000_v11, %v997_v6  ;;  %v1023_v20 = vstv %s1255_s20  ;;  %v1020_v49 = vsel %vm1018_vm11, %v1019_v23, 0.0 }
 0x265   : > { %v1024_v54 = vsel %vm1022_vm12, %v1023_v20, 0.0 }
 0x266   : > { %v1005_v14 = vadd.f32 %v1004_v13, %v1001_v8  ;;  %s1257_s25 = spop %1256 }
 0x267   : > { %v1015_v18 = vstv %s1257_s25 }
 0x268   : > { %v1009_v19 = vadd.f32 %v1008_v62, %v1005_v14  ;;  %v1016_v22 = vsel %vm1014_vm10, %v1015_v18, 0.0 }
 0x26a   : > { %v1013_v48 = vadd.f32 %v1012_v21, %v1009_v19 }
 0x26c   : > { %v1017_v47 = vadd.f32 %v1016_v22, %v1013_v48 }
 0x26e   : > { %v1021_v24 = vadd.f32 %v1020_v49, %v1017_v47 }
 0x270   : > { %v1025_v27 = vadd.f32 %v1024_v54, %v1021_v24 }
 0x272   : > { %v1029_v30 = vadd.f32 %v1028_v28, %v1025_v27 }
 0x274   : > { %v1033_v36 = vadd.f32 %v1032_v31, %v1029_v30 }
 0x276   : > { %v1037_v7 = vadd.f32 %v1036_v37, %v1033_v36 }
 0x278   : > { %v1039_v9 = vadd.f32 %v1038_v39, %v1037_v7 }
 0x27a   : > { %1040 = vst [vmem:[%s1687_s21] sm:$0x1] %v1039_v9 }
 0x27b PF: > { %s1688_s29 = sld [smem:[#allocation2_spill]] }
 0x281   : > { %s22_s21 = sadd.s32 1, %s1688_s29  }
 0x282   : > { %p19_p5 = scmp.ge.s32.totalorder %s22_s21, 4  }
 0x284   :  { %21 = sbr.rel (!%p19_p5) target bundleno = 4 (0x4), region = 131 }

</bundles_post_ra>
